<compile_context>
chip_gen: v7x
topology: tpu7x:2x2x1
jax: 0.10.0
libtpu: 0.0.40
codegen_flags: <defaults>
</compile_context>

<pallas_src>
import functools

import jax
import jax.numpy as jnp
from jax.experimental import pallas as pl
from jax.experimental.pallas import tpu as pltpu

_BN_EPS = 1e-5


def _default_vmem_limit():
    """Per-generation scoped VMEM limit: ~3/4 of physical, capped at 100 MiB."""
    try:
        info = pltpu.get_tpu_info()
        cap = getattr(info, "vmem_capacity_bytes", None)
        if cap:
            return int(min(cap * 3 // 4, 100 * 1024 * 1024))
    except Exception:
        pass
    return 48 * 1024 * 1024          # safe on every generation (v7x: 64 MiB physical)


_VMEM_LIMIT = _default_vmem_limit()


def _compiler_params(dim_sem):
    return pltpu.CompilerParams(dimension_semantics=dim_sem,
                                vmem_limit_bytes=_VMEM_LIMIT)


def _pick_row_tile(H, W, C1, C2, Cout, budget_bytes=8 << 20):
    """Rows per conv tile: largest divisor of H whose per-step working set (bf16 padded
    scratch + bf16 tap patch + f32 accumulator/output + double-buffered f32 input tiles)
    stays under `budget_bytes`."""
    C = C1 + C2
    per_row = W * (2 * C        # bf16 padded-scratch row
                   + 2 * C      # bf16 tap-patch row
                   + 12 * Cout  # f32 accumulator + double-buffered output row
                   + 8 * C)     # double-buffered f32 input rows
    if per_row * H <= budget_bytes:
        return H
    best = None
    for th in range(1, H):
        if H % th == 0 and (th * W) % 8 == 0 and per_row * th <= budget_bytes:
            best = th
    return best if best is not None else H


def _row_tile(rows, max_rows=2048):
    """Row tile for the final 1x1 conv: divisor of `rows`, multiple of 8."""
    if rows <= max_rows:
        return rows
    for tr in range(max_rows, 7, -8):
        if rows % tr == 0:
            return tr
    return rows


# ------------------------------------------------------------- fused 3x3 conv kernel
def _conv3x3_kernel(*refs, W, C1, C2, Cout, TH, T, apply_norm):
    # refs: [scale, shift,] x1_tile, x1_top, x1_bot, [x2_tile, x2_top, x2_bot,]
    #       w, b | y, stats | pad_scratch
    idx = 0
    if apply_norm:
        sc_ref, sh_ref = refs[0], refs[1]
        idx = 2
    x1_ref, x1t_ref, x1b_ref = refs[idx], refs[idx + 1], refs[idx + 2]
    idx += 3
    if C2 > 0:
        x2_ref, x2t_ref, x2b_ref = refs[idx], refs[idx + 1], refs[idx + 2]
        idx += 3
    w_ref, b_ref = refs[idx], refs[idx + 1]
    y_ref, st_ref = refs[idx + 2], refs[idx + 3]
    pad_ref = refs[idx + 4]

    C = C1 + C2
    t = pl.program_id(1)

    # --- zero only the 1-pixel border of the tile-local padded scratch ---
    pad_ref[:, 0:1, :] = jnp.zeros((TH + 2, 1, C), jnp.bfloat16)
    pad_ref[:, W + 1:W + 2, :] = jnp.zeros((TH + 2, 1, C), jnp.bfloat16)
    pad_ref[0:1, :, :] = jnp.zeros((1, W + 2, C), jnp.bfloat16)
    pad_ref[TH + 1:TH + 2, :, :] = jnp.zeros((1, W + 2, C), jnp.bfloat16)

    def prep1(v):
        # Previous conv's BatchNorm + ReLU folded into this conv's input stage (f32 math),
        # then cast to bf16 for the MXU.
        if apply_norm:
            v = jnp.maximum(v * sc_ref[...] + sh_ref[...], 0.0)
        return v.astype(jnp.bfloat16)

    # --- interior rows of this tile (decoder concat fused via the channel ranges) ---
    pad_ref[1:TH + 1, 1:W + 1, 0:C1] = prep1(x1_ref[0])
    if C2 > 0:
        pad_ref[1:TH + 1, 1:W + 1, C1:C] = x2_ref[0].astype(jnp.bfloat16)

    # --- halo rows (left as zeros at the image boundary) ---
    @pl.when(t > 0)
    def _top():
        pad_ref[0:1, 1:W + 1, 0:C1] = prep1(x1t_ref[0])
        if C2 > 0:
            pad_ref[0:1, 1:W + 1, C1:C] = x2t_ref[0].astype(jnp.bfloat16)

    @pl.when(t < T - 1)
    def _bot():
        pad_ref[TH + 1:TH + 2, 1:W + 1, 0:C1] = prep1(x1b_ref[0])
        if C2 > 0:
            pad_ref[TH + 1:TH + 2, 1:W + 1, C1:C] = x2b_ref[0].astype(jnp.bfloat16)

    # --- 9 per-tap bf16 MXU matmuls accumulated in f32 (no im2col buffer) ---
    acc = jnp.zeros((TH * W, Cout), jnp.float32)
    for kh in range(3):
        for kw in range(3):
            patch = pad_ref[kh:kh + TH, kw:kw + W, :].reshape(TH * W, C)
            acc = acc + jnp.dot(patch, w_ref[kh * 3 + kw],
                                preferred_element_type=jnp.float32)
    y = acc + b_ref[...]
    y_ref[0] = y

    # --- per-tile BatchNorm partial stats (finalized cheaply in XLA) ---
    s = jnp.sum(y, axis=0, keepdims=True)
    ss = jnp.sum(y * y, axis=0, keepdims=True)
    st_ref[0, 0] = jnp.concatenate([s, ss], axis=0)


def conv3x3(x1, w, b, x2=None, norm=None, tile_rows=None):
    """Fused 3x3 conv (padding=1) + bias with optional fused input BN+ReLU on x1 and
    optional fused channel-concat of a second (already-activated) input x2.

    x1: (N,H,W,C1) f32;  x2: optional (N,H,W,C2) f32;  norm: optional (scale, shift) (C1,)
    w : (9, C1+C2, Cout) bf16;  b: (Cout,) f32
    returns: raw conv output (N,H,W,Cout) f32 and BatchNorm stats (2, Cout) f32
             (sum, sum-of-squares over N*H*W).
    """
    N, H, W, C1 = x1.shape
    C2 = 0 if x2 is None else x2.shape[-1]
    C = C1 + C2
    Cout = w.shape[-1]
    assert w.shape == (9, C, Cout), (w.shape, C, Cout)
    apply_norm = norm is not None

    TH = tile_rows if tile_rows is not None else _pick_row_tile(H, W, C1, C2, Cout)
    assert H % TH == 0, (H, TH)
    T = H // TH
    assert T == 1 or (TH * W) % 8 == 0, (TH, W)

    kern = functools.partial(_conv3x3_kernel, W=W, C1=C1, C2=C2, Cout=Cout,
                             TH=TH, T=T, apply_norm=apply_norm)

    def tile_map(n, t):
        return (n, t, 0, 0)

    def top_map(n, t):                       # halo row above the tile (clamped)
        return (n, jnp.maximum(t * TH - 1, 0), 0, 0)

    def bot_map(n, t):                       # halo row below the tile (clamped)
        return (n, jnp.minimum((t + 1) * TH, H - 1), 0, 0)

    inputs, in_specs = [], []
    if apply_norm:
        sc, sh = norm
        inputs += [sc.reshape(1, C1), sh.reshape(1, C1)]
        in_specs += [pl.BlockSpec((1, C1), lambda n, t: (0, 0))] * 2
    inputs += [x1, x1, x1]
    in_specs += [pl.BlockSpec((1, TH, W, C1), tile_map),
                 pl.BlockSpec((1, 1, W, C1), top_map),
                 pl.BlockSpec((1, 1, W, C1), bot_map)]
    if C2 > 0:
        inputs += [x2, x2, x2]
        in_specs += [pl.BlockSpec((1, TH, W, C2), tile_map),
                     pl.BlockSpec((1, 1, W, C2), top_map),
                     pl.BlockSpec((1, 1, W, C2), bot_map)]
    inputs += [w, b.reshape(1, Cout)]
    in_specs += [pl.BlockSpec((9, C, Cout), lambda n, t: (0, 0, 0)),
                 pl.BlockSpec((1, Cout), lambda n, t: (0, 0))]

    y, st = pl.pallas_call(
        kern,
        out_shape=(jax.ShapeDtypeStruct((N, H * W, Cout), jnp.float32),
                   jax.ShapeDtypeStruct((N, T, 2, Cout), jnp.float32)),
        grid=(N, T),
        in_specs=in_specs,
        out_specs=(pl.BlockSpec((1, TH * W, Cout), lambda n, t: (n, t, 0)),
                   pl.BlockSpec((1, 1, 2, Cout), lambda n, t: (n, t, 0, 0))),
        scratch_shapes=[pltpu.VMEM((TH + 2, W + 2, C), jnp.bfloat16)],
        compiler_params=_compiler_params(("parallel", "parallel")),
    )(*inputs)
    return y.reshape(N, H, W, Cout), st.sum(axis=(0, 1))


# -------------------------------------------------- BatchNorm finalize (tiny, in XLA)
def _bn_scale_shift(stats, gamma, beta, count, eps=_BN_EPS):
    mean = stats[0] / count
    var = jnp.maximum(stats[1] / count - mean * mean, 0.0)       # biased batch variance
    scale = gamma * jax.lax.rsqrt(var + eps)
    shift = beta - mean * scale
    return scale, shift


def bn_relu(y, scale, shift):
    """Plain-jnp BN+ReLU; only used right in front of XLA pool / upsample ops, where XLA
    fuses it into the consumer (no extra HBM round trip)."""
    return jnp.maximum(y * scale + shift, 0.0)


# ----------------------------------------- fused final BN+ReLU + 1x1 conv (Cout = 2)
def _bn_relu_conv1x1_kernel(x_ref, sc_ref, sh_ref, w_ref, b_ref, o_ref):
    a = jnp.maximum(x_ref[...] * sc_ref[...] + sh_ref[...], 0.0)
    o_ref[...] = jnp.dot(a.astype(jnp.bfloat16), w_ref[...],
                         preferred_element_type=jnp.float32) + b_ref[...]


def bn_relu_conv1x1(y, scale, shift, w, b):
    """Fuses the last block's BN+ReLU with the final 1x1 conv.  The output keeps its true
    channel width (Cout=2): stores are masked but tiny, instead of the old 64x pad-to-128
    write inflation.  Returns NCHW."""
    N, H, W, C = y.shape
    Cout = w.shape[-1]
    rows = N * H * W
    tr = _row_tile(rows)
    y2 = y.reshape(rows, C)
    out = pl.pallas_call(
        _bn_relu_conv1x1_kernel,
        out_shape=jax.ShapeDtypeStruct((rows, Cout), jnp.float32),
        grid=(rows // tr,),
        in_specs=[pl.BlockSpec((tr, C), lambda i: (i, 0)),
                  pl.BlockSpec((1, C), lambda i: (0, 0)),
                  pl.BlockSpec((1, C), lambda i: (0, 0)),
                  pl.BlockSpec((C, Cout), lambda i: (0, 0)),
                  pl.BlockSpec((1, Cout), lambda i: (0, 0))],
        out_specs=pl.BlockSpec((tr, Cout), lambda i: (i, 0)),
        compiler_params=_compiler_params(("parallel",)),
    )(y2, scale.reshape(1, C), shift.reshape(1, C), w, b.reshape(1, Cout))
    # tiny 2-channel tensor: reshape/transpose to NCHW in XLA
    return jnp.transpose(out.reshape(N, H, W, Cout), (0, 3, 1, 2))


# ------------------------------------------------------------------------- glue ops
def maxpool2(x):
    N, H, W, C = x.shape
    return x.reshape(N, H // 2, 2, W // 2, 2, C).max(axis=(2, 4))


def _upsample_weights(n_in, n_out):
    if n_in == 1:
        return jnp.ones((n_out, 1), jnp.float32)
    pos = jnp.arange(n_out, dtype=jnp.float32) * (n_in - 1) / (n_out - 1)
    lo = jnp.clip(jnp.floor(pos).astype(jnp.int32), 0, n_in - 2)
    frac = pos - lo.astype(jnp.float32)
    m = jnp.zeros((n_out, n_in), jnp.float32)
    m = m.at[jnp.arange(n_out), lo].add(1.0 - frac)
    m = m.at[jnp.arange(n_out), lo + 1].add(frac)
    return m


def upsample_bilinear_x2(x):
    # nn.Upsample(scale_factor=2, mode='bilinear', align_corners=True)
    N, H, W, C = x.shape
    Wh = _upsample_weights(H, 2 * H)
    Ww = _upsample_weights(W, 2 * W)
    y = jnp.einsum('oh,nhwc->nowc', Wh, x)
    y = jnp.einsum('pw,nowc->nopc', Ww, y)
    return y


# ----------------------------------------------------------------------- parameters
def _init_conv3x3_params(key, cin, cout, cin_pad=None):
    k1, k2 = jax.random.split(key)
    fan_in = cin * 9
    bound = float(fan_in) ** -0.5
    w = jax.random.uniform(k1, (3, 3, cin, cout), jnp.float32, -bound, bound)
    b = jax.random.uniform(k2, (cout,), jnp.float32, -bound, bound)
    if cin_pad is not None and cin_pad > cin:
        w = jnp.pad(w, ((0, 0), (0, 0), (0, cin_pad - cin), (0, 0)))
        cin = cin_pad
    # tap-major layout (kh*3 + kw, ci, co); matches in-kernel w_ref[kh*3+kw] use.
    return w.reshape(9, cin, cout).astype(jnp.bfloat16), b


def _init_block(key, cin, mid, cout, cin_pad=None):
    k1, k2 = jax.random.split(key)
    w1, b1 = _init_conv3x3_params(k1, cin, mid, cin_pad=cin_pad)
    w2, b2 = _init_conv3x3_params(k2, mid, cout)
    return dict(w1=w1, b1=b1,
                g1=jnp.ones((mid,), jnp.float32), bt1=jnp.zeros((mid,), jnp.float32),
                w2=w2, b2=b2,
                g2=jnp.ones((cout,), jnp.float32), bt2=jnp.zeros((cout,), jnp.float32))


def init_unet_params(key, in_ch=1, out_ch=2):
    n1 = 32
    f = [n1, n1 * 2, n1 * 4, n1 * 8, n1 * 16]
    keys = jax.random.split(key, 10)
    params = {
        'conv0_0': _init_block(keys[0], in_ch, f[0], f[0], cin_pad=max(in_ch, 8)),
        'conv1_0': _init_block(keys[1], f[0], f[1], f[1]),
        'conv2_0': _init_block(keys[2], f[1], f[2], f[2]),
        'conv3_0': _init_block(keys[3], f[2], f[3], f[3]),
        'conv4_0': _init_block(keys[4], f[3], f[4], f[4]),
        'conv3_1': _init_block(keys[5], f[3] + f[4], f[3], f[3]),
        'conv2_2': _init_block(keys[6], f[2] + f[3], f[2], f[2]),
        'conv1_3': _init_block(keys[7], f[1] + f[2], f[1], f[1]),
        'conv0_4': _init_block(keys[8], f[0] + f[1], f[0], f[0]),
    }
    kf1, kf2 = jax.random.split(keys[9])
    bound = float(f[0]) ** -0.5
    wf = jax.random.uniform(kf1, (f[0], out_ch), jnp.float32, -bound, bound)
    bf = jax.random.uniform(kf2, (out_ch,), jnp.float32, -bound, bound)
    params['final_w'] = wf.astype(jnp.bfloat16)
    params['final_b'] = bf
    return params


# -------------------------------------------------------------------------- forward
def conv_block_apply(p, x1, x2=None, norm1=None):
    """conv_block forward. x1 may be a *raw* previous conv output whose BN+ReLU is
    passed via norm1=(scale, shift) and applied inside the conv kernel; x2, if given,
    is an already-activated tensor concatenated on the channel axis inside the kernel.
    Returns the block's raw conv2 output and its bn2 (scale, shift)."""
    y1, st1 = conv3x3(x1, p['w1'], p['b1'], x2=x2, norm=norm1)
    n, h, w, _ = y1.shape
    cnt = float(n * h * w)
    sc1, sh1 = _bn_scale_shift(st1, p['g1'], p['bt1'], cnt)
    # bn1 + ReLU fused into the second conv's input stage.
    y2, st2 = conv3x3(y1, p['w2'], p['b2'], norm=(sc1, sh1))
    sc2, sh2 = _bn_scale_shift(st2, p['g2'], p['bt2'], cnt)
    return y2, (sc2, sh2)


def unet_forward(params, x_nchw):
    x = jnp.transpose(x_nchw, (0, 2, 3, 1)).astype(jnp.float32)       # NCHW -> NHWC
    cin_pad = params['conv0_0']['w1'].shape[1]
    if x.shape[-1] < cin_pad:                                          # stem: pad Cin to 8
        x = jnp.pad(x, ((0, 0), (0, 0), (0, 0), (0, cin_pad - x.shape[-1])))

    # Encoder: blocks return raw conv2 output + bn2 scale/shift; BN+ReLU is applied by
    # the consumer (fused into the next conv kernel, or fused by XLA into pool/upsample).
    y00, n00 = conv_block_apply(params['conv0_0'], x)
    y10, n10 = conv_block_apply(params['conv1_0'], maxpool2(bn_relu(y00, *n00)))
    y20, n20 = conv_block_apply(params['conv2_0'], maxpool2(bn_relu(y10, *n10)))
    y30, n30 = conv_block_apply(params['conv3_0'], maxpool2(bn_relu(y20, *n20)))
    y40, n40 = conv_block_apply(params['conv4_0'], maxpool2(bn_relu(y30, *n30)))

    # Decoder: skip connections enter the conv kernel raw (their BN folded via norm1);
    # the upsampled path is activated in XLA (fused into the upsample) at low resolution.
    up = upsample_bilinear_x2
    y31, n31 = conv_block_apply(params['conv3_1'], y30, up(bn_relu(y40, *n40)), norm1=n30)
    y22, n22 = conv_block_apply(params['conv2_2'], y20, up(bn_relu(y31, *n31)), norm1=n20)
    y13, n13 = conv_block_apply(params['conv1_3'], y10, up(bn_relu(y22, *n22)), norm1=n10)
    y04, n04 = conv_block_apply(params['conv0_4'], y00, up(bn_relu(y13, *n13)), norm1=n00)

    # Final block's bn2 + ReLU fused with the 1x1 conv; returns NCHW directly.
    return bn_relu_conv1x1(y04, n04[0], n04[1], params['final_w'], params['final_b'])


if __name__ == "__main__":
    key = jax.random.PRNGKey(0)
    k_param, k_input, k_cx, k_cw = jax.random.split(key, 4)

    # --- multi-tile halo self-check against an XLA conv (exercises T > 1) ---
    xt = jax.random.normal(k_cx, (1, 16, 16, 32), jnp.float32)
    wt, bt = _init_conv3x3_params(k_cw, 32, 64)
    y_tiled, _ = jax.jit(functools.partial(conv3x3, tile_rows=4))(xt, wt, bt)
    xq = xt.astype(jnp.bfloat16).astype(jnp.float32)
    wq = wt.astype(jnp.float32).reshape(3, 3, 32, 64)
    y_ref = jax.lax.conv_general_dilated(
        xq, wq, (1, 1), 'SAME', dimension_numbers=('NHWC', 'HWIO', 'NHWC')) + bt
    assert jnp.allclose(y_tiled, y_ref, atol=2e-2, rtol=2e-2), \
        float(jnp.max(jnp.abs(y_tiled - y_ref)))

    # --- full UNet forward (NCHW input, like PyTorch) ---
    params = init_unet_params(k_param, in_ch=1, out_ch=2)
    x = jax.random.normal(k_input, (2, 1, 16, 16), dtype=jnp.float32)

    fwd = jax.jit(unet_forward)
    out = jax.block_until_ready(fwd(params, x))

    assert out.shape == (2, 2, 16, 16), out.shape
    assert bool(jnp.all(jnp.isfinite(out)))
    print("KERNEL_OK")
</pallas_src>

<mosaic_0001>
module attributes {stable_mosaic.version = 11 : i64} {
  func.func @_conv3x3_kernel(%arg0: i32, %arg1: i32, %arg2: memref<1x4x16x32xf32, #tpu.memory_space<vmem>>, %arg3: memref<1x1x16x32xf32, #tpu.memory_space<vmem>>, %arg4: memref<1x1x16x32xf32, #tpu.memory_space<vmem>>, %arg5: memref<9x32x64xbf16, #tpu.memory_space<vmem>>, %arg6: memref<1x64xf32, #tpu.memory_space<vmem>>, %arg7: memref<1x64x64xf32, #tpu.memory_space<vmem>>, %arg8: memref<1x1x2x64xf32, #tpu.memory_space<vmem>>, %arg9: memref<6x18x32xbf16, #tpu.memory_space<vmem>>) attributes {dimension_semantics = [#tpu.dimension_semantics<parallel>, #tpu.dimension_semantics<parallel>], iteration_bounds = array<i64: 1, 4>, scalar_prefetch = 0 : i64, scratch_operands = 1 : i64, tpu.core_type = #tpu.core_type<tc>, window_params = [{transform_indices = @transform_0, window_bounds = array<i64: 1, 4, 16, 32>}, {transform_indices = @transform_1, window_bounds = array<i64: 1, 1, 16, 32>}, {transform_indices = @transform_2, window_bounds = array<i64: 1, 1, 16, 32>}, {pipeline_mode = #tpu.pipeline_mode<synchronous>, transform_indices = @transform_3, window_bounds = array<i64: 9, 32, 64>}, {pipeline_mode = #tpu.pipeline_mode<synchronous>, transform_indices = @transform_4, window_bounds = array<i64: 1, 64>}, {transform_indices = @transform_5, window_bounds = array<i64: 1, 64, 64>}, {transform_indices = @transform_6, window_bounds = array<i64: 1, 1, 2, 64>}]} {
    %cst = arith.constant 0.000000e+00 : bf16
    %0 = vector.broadcast %cst : bf16 to vector<6x1x32xbf16>
    %c0 = arith.constant 0 : index
    %c0_0 = arith.constant 0 : index
    %c0_1 = arith.constant 0 : index
    %1 = vector.load %arg9[%c0, %c0_0, %c0_1] : memref<6x18x32xbf16, #tpu.memory_space<vmem>>, vector<6x1x32xbf16>
    tpu.vector_store %arg9[%c0, %c0_0, %c0_1], %0 {strides = array<i32>} : memref<6x18x32xbf16, #tpu.memory_space<vmem>>, vector<6x1x32xbf16>,
    %cst_2 = arith.constant 0.000000e+00 : bf16
    %2 = vector.broadcast %cst_2 : bf16 to vector<6x1x32xbf16>
    %c0_3 = arith.constant 0 : index
    %c17 = arith.constant 17 : index
    %c0_4 = arith.constant 0 : index
    %3 = vector.load %arg9[%c0_3, %c17, %c0_4] : memref<6x18x32xbf16, #tpu.memory_space<vmem>>, vector<6x1x32xbf16>
    tpu.vector_store %arg9[%c0_3, %c17, %c0_4], %2 {strides = array<i32>} : memref<6x18x32xbf16, #tpu.memory_space<vmem>>, vector<6x1x32xbf16>,
    %cst_5 = arith.constant 0.000000e+00 : bf16
    %4 = vector.broadcast %cst_5 : bf16 to vector<1x18x32xbf16>
    %c0_6 = arith.constant 0 : index
    %c0_7 = arith.constant 0 : index
    %c0_8 = arith.constant 0 : index
    %5 = vector.load %arg9[%c0_6, %c0_7, %c0_8] : memref<6x18x32xbf16, #tpu.memory_space<vmem>>, vector<1x18x32xbf16>
    tpu.vector_store %arg9[%c0_6, %c0_7, %c0_8], %4 {strides = array<i32>} : memref<6x18x32xbf16, #tpu.memory_space<vmem>>, vector<1x18x32xbf16>,
    %cst_9 = arith.constant 0.000000e+00 : bf16
    %6 = vector.broadcast %cst_9 : bf16 to vector<1x18x32xbf16>
    %c5 = arith.constant 5 : index
    %c0_10 = arith.constant 0 : index
    %c0_11 = arith.constant 0 : index
    %7 = vector.load %arg9[%c5, %c0_10, %c0_11] : memref<6x18x32xbf16, #tpu.memory_space<vmem>>, vector<1x18x32xbf16>
    tpu.vector_store %arg9[%c5, %c0_10, %c0_11], %6 {strides = array<i32>} : memref<6x18x32xbf16, #tpu.memory_space<vmem>>, vector<1x18x32xbf16>,
    %c0_12 = arith.constant 0 : index
    %c0_13 = arith.constant 0 : index
    %c0_14 = arith.constant 0 : index
    %c0_15 = arith.constant 0 : index
    %8 = vector.load %arg2[%c0_12, %c0_13, %c0_14, %c0_15] : memref<1x4x16x32xf32, #tpu.memory_space<vmem>>, vector<1x4x16x32xf32>
    %9 = vector.shape_cast %8 : vector<1x4x16x32xf32> to vector<4x16x32xf32>
    %10 = arith.truncf %9 : vector<4x16x32xf32> to vector<4x16x32xbf16>
    %c1 = arith.constant 1 : index
    %c1_16 = arith.constant 1 : index
    %c0_17 = arith.constant 0 : index
    %11 = vector.load %arg9[%c1, %c1_16, %c0_17] : memref<6x18x32xbf16, #tpu.memory_space<vmem>>, vector<4x16x32xbf16>
    tpu.vector_store %arg9[%c1, %c1_16, %c0_17], %10 {strides = array<i32>} : memref<6x18x32xbf16, #tpu.memory_space<vmem>>, vector<4x16x32xbf16>,
    %c0_i32 = arith.constant 0 : i32
    %12 = arith.cmpi sgt, %arg1, %c0_i32 : i32
    %13 = arith.extui %12 : i1 to i32
    %c0_i32_18 = arith.constant 0 : i32
    %14 = arith.cmpi ne, %13, %c0_i32_18 : i32
    scf.if %14 {
      %c0_89 = arith.constant 0 : index
      %c0_90 = arith.constant 0 : index
      %c0_91 = arith.constant 0 : index
      %c0_92 = arith.constant 0 : index
      %88 = vector.load %arg3[%c0_89, %c0_90, %c0_91, %c0_92] : memref<1x1x16x32xf32, #tpu.memory_space<vmem>>, vector<1x1x16x32xf32>
      %89 = vector.shape_cast %88 : vector<1x1x16x32xf32> to vector<1x16x32xf32>
      %90 = arith.truncf %89 : vector<1x16x32xf32> to vector<1x16x32xbf16>
      %c0_93 = arith.constant 0 : index
      %c1_94 = arith.constant 1 : index
      %c0_95 = arith.constant 0 : index
      %91 = vector.load %arg9[%c0_93, %c1_94, %c0_95] : memref<6x18x32xbf16, #tpu.memory_space<vmem>>, vector<1x16x32xbf16>
      tpu.vector_store %arg9[%c0_93, %c1_94, %c0_95], %90 {strides = array<i32>} : memref<6x18x32xbf16, #tpu.memory_space<vmem>>, vector<1x16x32xbf16>,
    } else {
    }
    %c3_i32 = arith.constant 3 : i32
    %15 = arith.cmpi slt, %arg1, %c3_i32 : i32
    %16 = arith.extui %15 : i1 to i32
    %c0_i32_19 = arith.constant 0 : i32
    %17 = arith.cmpi ne, %16, %c0_i32_19 : i32
    scf.if %17 {
      %c0_89 = arith.constant 0 : index
      %c0_90 = arith.constant 0 : index
      %c0_91 = arith.constant 0 : index
      %c0_92 = arith.constant 0 : index
      %88 = vector.load %arg4[%c0_89, %c0_90, %c0_91, %c0_92] : memref<1x1x16x32xf32, #tpu.memory_space<vmem>>, vector<1x1x16x32xf32>
      %89 = vector.shape_cast %88 : vector<1x1x16x32xf32> to vector<1x16x32xf32>
      %90 = arith.truncf %89 : vector<1x16x32xf32> to vector<1x16x32xbf16>
      %c5_93 = arith.constant 5 : index
      %c1_94 = arith.constant 1 : index
      %c0_95 = arith.constant 0 : index
      %91 = vector.load %arg9[%c5_93, %c1_94, %c0_95] : memref<6x18x32xbf16, #tpu.memory_space<vmem>>, vector<1x16x32xbf16>
      tpu.vector_store %arg9[%c5_93, %c1_94, %c0_95], %90 {strides = array<i32>} : memref<6x18x32xbf16, #tpu.memory_space<vmem>>, vector<1x16x32xbf16>,
    } else {
    }
    %cst_20 = arith.constant 0.000000e+00 : f32
    %18 = vector.broadcast %cst_20 : f32 to vector<64x64xf32>
    %c0_21 = arith.constant 0 : index
    %c0_22 = arith.constant 0 : index
    %c0_23 = arith.constant 0 : index
    %19 = vector.load %arg9[%c0_21, %c0_22, %c0_23] : memref<6x18x32xbf16, #tpu.memory_space<vmem>>, vector<4x16x32xbf16>
    %20 = vector.shape_cast %19 : vector<4x16x32xbf16> to vector<64x32xbf16>
    %c0_24 = arith.constant 0 : index
    %c0_25 = arith.constant 0 : index
    %c0_26 = arith.constant 0 : index
    %21 = vector.load %arg5[%c0_24, %c0_25, %c0_26] : memref<9x32x64xbf16, #tpu.memory_space<vmem>>, vector<1x32x64xbf16>
    %22 = vector.shape_cast %21 : vector<1x32x64xbf16> to vector<32x64xbf16>
    %cst_27 = arith.constant dense<0.000000e+00> : vector<64x64xf32>
    %23 = tpu.matmul %20, %22, %cst_27 {dimension_numbers = #tpu.dot_dimension_numbers<[1], [0], [0], [1], [0, 0, 1, 1], [], []>} : vector<64x32xbf16>, vector<32x64xbf16>, vector<64x64xf32> -> vector<64x64xf32>
    %24 = arith.addf %18, %23 : vector<64x64xf32>
    %c0_28 = arith.constant 0 : index
    %c1_29 = arith.constant 1 : index
    %c0_30 = arith.constant 0 : index
    %25 = vector.load %arg9[%c0_28, %c1_29, %c0_30] : memref<6x18x32xbf16, #tpu.memory_space<vmem>>, vector<4x16x32xbf16>
    %26 = vector.shape_cast %25 : vector<4x16x32xbf16> to vector<64x32xbf16>
    %c1_31 = arith.constant 1 : index
    %c0_32 = arith.constant 0 : index
    %c0_33 = arith.constant 0 : index
    %27 = vector.load %arg5[%c1_31, %c0_32, %c0_33] : memref<9x32x64xbf16, #tpu.memory_space<vmem>>, vector<1x32x64xbf16>
    %28 = vector.shape_cast %27 : vector<1x32x64xbf16> to vector<32x64xbf16>
    %cst_34 = arith.constant dense<0.000000e+00> : vector<64x64xf32>
    %29 = tpu.matmul %26, %28, %cst_34 {dimension_numbers = #tpu.dot_dimension_numbers<[1], [0], [0], [1], [0, 0, 1, 1], [], []>} : vector<64x32xbf16>, vector<32x64xbf16>, vector<64x64xf32> -> vector<64x64xf32>
    %30 = arith.addf %24, %29 : vector<64x64xf32>
    %c0_35 = arith.constant 0 : index
    %c2 = arith.constant 2 : index
    %c0_36 = arith.constant 0 : index
    %31 = vector.load %arg9[%c0_35, %c2, %c0_36] : memref<6x18x32xbf16, #tpu.memory_space<vmem>>, vector<4x16x32xbf16>
    %32 = vector.shape_cast %31 : vector<4x16x32xbf16> to vector<64x32xbf16>
    %c2_37 = arith.constant 2 : index
    %c0_38 = arith.constant 0 : index
    %c0_39 = arith.constant 0 : index
    %33 = vector.load %arg5[%c2_37, %c0_38, %c0_39] : memref<9x32x64xbf16, #tpu.memory_space<vmem>>, vector<1x32x64xbf16>
    %34 = vector.shape_cast %33 : vector<1x32x64xbf16> to vector<32x64xbf16>
    %cst_40 = arith.constant dense<0.000000e+00> : vector<64x64xf32>
    %35 = tpu.matmul %32, %34, %cst_40 {dimension_numbers = #tpu.dot_dimension_numbers<[1], [0], [0], [1], [0, 0, 1, 1], [], []>} : vector<64x32xbf16>, vector<32x64xbf16>, vector<64x64xf32> -> vector<64x64xf32>
    %36 = arith.addf %30, %35 : vector<64x64xf32>
    %c1_41 = arith.constant 1 : index
    %c0_42 = arith.constant 0 : index
    %c0_43 = arith.constant 0 : index
    %37 = vector.load %arg9[%c1_41, %c0_42, %c0_43] : memref<6x18x32xbf16, #tpu.memory_space<vmem>>, vector<4x16x32xbf16>
    %38 = vector.shape_cast %37 : vector<4x16x32xbf16> to vector<64x32xbf16>
    %c3 = arith.constant 3 : index
    %c0_44 = arith.constant 0 : index
    %c0_45 = arith.constant 0 : index
    %39 = vector.load %arg5[%c3, %c0_44, %c0_45] : memref<9x32x64xbf16, #tpu.memory_space<vmem>>, vector<1x32x64xbf16>
    %40 = vector.shape_cast %39 : vector<1x32x64xbf16> to vector<32x64xbf16>
    %cst_46 = arith.constant dense<0.000000e+00> : vector<64x64xf32>
    %41 = tpu.matmul %38, %40, %cst_46 {dimension_numbers = #tpu.dot_dimension_numbers<[1], [0], [0], [1], [0, 0, 1, 1], [], []>} : vector<64x32xbf16>, vector<32x64xbf16>, vector<64x64xf32> -> vector<64x64xf32>
    %42 = arith.addf %36, %41 : vector<64x64xf32>
    %c1_47 = arith.constant 1 : index
    %c1_48 = arith.constant 1 : index
    %c0_49 = arith.constant 0 : index
    %43 = vector.load %arg9[%c1_47, %c1_48, %c0_49] : memref<6x18x32xbf16, #tpu.memory_space<vmem>>, vector<4x16x32xbf16>
    %44 = vector.shape_cast %43 : vector<4x16x32xbf16> to vector<64x32xbf16>
    %c4 = arith.constant 4 : index
    %c0_50 = arith.constant 0 : index
    %c0_51 = arith.constant 0 : index
    %45 = vector.load %arg5[%c4, %c0_50, %c0_51] : memref<9x32x64xbf16, #tpu.memory_space<vmem>>, vector<1x32x64xbf16>
    %46 = vector.shape_cast %45 : vector<1x32x64xbf16> to vector<32x64xbf16>
    %cst_52 = arith.constant dense<0.000000e+00> : vector<64x64xf32>
    %47 = tpu.matmul %44, %46, %cst_52 {dimension_numbers = #tpu.dot_dimension_numbers<[1], [0], [0], [1], [0, 0, 1, 1], [], []>} : vector<64x32xbf16>, vector<32x64xbf16>, vector<64x64xf32> -> vector<64x64xf32>
    %48 = arith.addf %42, %47 : vector<64x64xf32>
    %c1_53 = arith.constant 1 : index
    %c2_54 = arith.constant 2 : index
    %c0_55 = arith.constant 0 : index
    %49 = vector.load %arg9[%c1_53, %c2_54, %c0_55] : memref<6x18x32xbf16, #tpu.memory_space<vmem>>, vector<4x16x32xbf16>
    %50 = vector.shape_cast %49 : vector<4x16x32xbf16> to vector<64x32xbf16>
    %c5_56 = arith.constant 5 : index
    %c0_57 = arith.constant 0 : index
    %c0_58 = arith.constant 0 : index
    %51 = vector.load %arg5[%c5_56, %c0_57, %c0_58] : memref<9x32x64xbf16, #tpu.memory_space<vmem>>, vector<1x32x64xbf16>
    %52 = vector.shape_cast %51 : vector<1x32x64xbf16> to vector<32x64xbf16>
    %cst_59 = arith.constant dense<0.000000e+00> : vector<64x64xf32>
    %53 = tpu.matmul %50, %52, %cst_59 {dimension_numbers = #tpu.dot_dimension_numbers<[1], [0], [0], [1], [0, 0, 1, 1], [], []>} : vector<64x32xbf16>, vector<32x64xbf16>, vector<64x64xf32> -> vector<64x64xf32>
    %54 = arith.addf %48, %53 : vector<64x64xf32>
    %c2_60 = arith.constant 2 : index
    %c0_61 = arith.constant 0 : index
    %c0_62 = arith.constant 0 : index
    %55 = vector.load %arg9[%c2_60, %c0_61, %c0_62] : memref<6x18x32xbf16, #tpu.memory_space<vmem>>, vector<4x16x32xbf16>
    %56 = vector.shape_cast %55 : vector<4x16x32xbf16> to vector<64x32xbf16>
    %c6 = arith.constant 6 : index
    %c0_63 = arith.constant 0 : index
    %c0_64 = arith.constant 0 : index
    %57 = vector.load %arg5[%c6, %c0_63, %c0_64] : memref<9x32x64xbf16, #tpu.memory_space<vmem>>, vector<1x32x64xbf16>
    %58 = vector.shape_cast %57 : vector<1x32x64xbf16> to vector<32x64xbf16>
    %cst_65 = arith.constant dense<0.000000e+00> : vector<64x64xf32>
    %59 = tpu.matmul %56, %58, %cst_65 {dimension_numbers = #tpu.dot_dimension_numbers<[1], [0], [0], [1], [0, 0, 1, 1], [], []>} : vector<64x32xbf16>, vector<32x64xbf16>, vector<64x64xf32> -> vector<64x64xf32>
    %60 = arith.addf %54, %59 : vector<64x64xf32>
    %c2_66 = arith.constant 2 : index
    %c1_67 = arith.constant 1 : index
    %c0_68 = arith.constant 0 : index
    %61 = vector.load %arg9[%c2_66, %c1_67, %c0_68] : memref<6x18x32xbf16, #tpu.memory_space<vmem>>, vector<4x16x32xbf16>
    %62 = vector.shape_cast %61 : vector<4x16x32xbf16> to vector<64x32xbf16>
    %c7 = arith.constant 7 : index
    %c0_69 = arith.constant 0 : index
    %c0_70 = arith.constant 0 : index
    %63 = vector.load %arg5[%c7, %c0_69, %c0_70] : memref<9x32x64xbf16, #tpu.memory_space<vmem>>, vector<1x32x64xbf16>
    %64 = vector.shape_cast %63 : vector<1x32x64xbf16> to vector<32x64xbf16>
    %cst_71 = arith.constant dense<0.000000e+00> : vector<64x64xf32>
    %65 = tpu.matmul %62, %64, %cst_71 {dimension_numbers = #tpu.dot_dimension_numbers<[1], [0], [0], [1], [0, 0, 1, 1], [], []>} : vector<64x32xbf16>, vector<32x64xbf16>, vector<64x64xf32> -> vector<64x64xf32>
    %66 = arith.addf %60, %65 : vector<64x64xf32>
    %c2_72 = arith.constant 2 : index
    %c2_73 = arith.constant 2 : index
    %c0_74 = arith.constant 0 : index
    %67 = vector.load %arg9[%c2_72, %c2_73, %c0_74] : memref<6x18x32xbf16, #tpu.memory_space<vmem>>, vector<4x16x32xbf16>
    %68 = vector.shape_cast %67 : vector<4x16x32xbf16> to vector<64x32xbf16>
    %c8 = arith.constant 8 : index
    %c0_75 = arith.constant 0 : index
    %c0_76 = arith.constant 0 : index
    %69 = vector.load %arg5[%c8, %c0_75, %c0_76] : memref<9x32x64xbf16, #tpu.memory_space<vmem>>, vector<1x32x64xbf16>
    %70 = vector.shape_cast %69 : vector<1x32x64xbf16> to vector<32x64xbf16>
    %cst_77 = arith.constant dense<0.000000e+00> : vector<64x64xf32>
    %71 = tpu.matmul %68, %70, %cst_77 {dimension_numbers = #tpu.dot_dimension_numbers<[1], [0], [0], [1], [0, 0, 1, 1], [], []>} : vector<64x32xbf16>, vector<32x64xbf16>, vector<64x64xf32> -> vector<64x64xf32>
    %72 = arith.addf %66, %71 : vector<64x64xf32>
    %c0_78 = arith.constant 0 : index
    %c0_79 = arith.constant 0 : index
    %73 = vector.load %arg6[%c0_78, %c0_79] : memref<1x64xf32, #tpu.memory_space<vmem>>, vector<1x64xf32>
    %74 = vector.broadcast %73 : vector<1x64xf32> to vector<64x64xf32>
    %75 = arith.addf %72, %74 : vector<64x64xf32>
    %c0_80 = arith.constant 0 : index
    %c0_81 = arith.constant 0 : index
    %c0_82 = arith.constant 0 : index
    %76 = vector.load %arg7[%c0_80, %c0_81, %c0_82] : memref<1x64x64xf32, #tpu.memory_space<vmem>>, vector<1x64x64xf32>
    %77 = vector.shape_cast %76 : vector<1x64x64xf32> to vector<64x64xf32>
    %78 = vector.shape_cast %75 : vector<64x64xf32> to vector<1x64x64xf32>
    tpu.vector_store %arg7[%c0_80, %c0_81, %c0_82], %78 {strides = array<i32>} : memref<1x64x64xf32, #tpu.memory_space<vmem>>, vector<1x64x64xf32>,
    %cst_83 = arith.constant dense<0.000000e+00> : vector<64xf32>
    %79 = vector.multi_reduction <add>, %75, %cst_83 [0] : vector<64x64xf32> to vector<64xf32>
    %80 = vector.shape_cast %79 : vector<64xf32> to vector<1x64xf32>
    %81 = arith.mulf %75, %75 : vector<64x64xf32>
    %cst_84 = arith.constant dense<0.000000e+00> : vector<64xf32>
    %82 = vector.multi_reduction <add>, %81, %cst_84 [0] : vector<64x64xf32> to vector<64xf32>
    %83 = vector.shape_cast %82 : vector<64xf32> to vector<1x64xf32>
    %84 = tpu.concatenate %80, %83 in 0 : vector<1x64xf32>, vector<1x64xf32> -> vector<2x64xf32>
    %c0_85 = arith.constant 0 : index
    %c0_86 = arith.constant 0 : index
    %c0_87 = arith.constant 0 : index
    %c0_88 = arith.constant 0 : index
    %85 = vector.load %arg8[%c0_85, %c0_86, %c0_87, %c0_88] : memref<1x1x2x64xf32, #tpu.memory_space<vmem>>, vector<1x1x2x64xf32>
    %86 = vector.shape_cast %85 : vector<1x1x2x64xf32> to vector<2x64xf32>
    %87 = vector.shape_cast %84 : vector<2x64xf32> to vector<1x1x2x64xf32>
    tpu.vector_store %arg8[%c0_85, %c0_86, %c0_87, %c0_88], %87 {strides = array<i32>} : memref<1x1x2x64xf32, #tpu.memory_space<vmem>>, vector<1x1x2x64xf32>,
    return
  }
  func.func @transform_0(%arg0: i32, %arg1: i32) -> (i32, i32, i32, i32) {
    %c0_i32 = arith.constant 0 : i32
    %c0_i32_0 = arith.constant 0 : i32
    %c0_i32_1 = arith.constant 0 : i32
    return %arg0, %arg1, %c0_i32, %c0_i32_0 : i32, i32, i32, i32
  }
  func.func @transform_1(%arg0: i32, %arg1: i32) -> (i32, i32, i32, i32) {
    %c4_i32 = arith.constant 4 : i32
    %0 = arith.muli %arg1, %c4_i32 : i32
    %c1_i32 = arith.constant 1 : i32
    %1 = arith.subi %0, %c1_i32 : i32
    %c0_i32 = arith.constant 0 : i32
    %2 = arith.maxsi %1, %c0_i32 : i32
    %c0_i32_0 = arith.constant 0 : i32
    %c0_i32_1 = arith.constant 0 : i32
    %c0_i32_2 = arith.constant 0 : i32
    return %arg0, %2, %c0_i32_0, %c0_i32_1 : i32, i32, i32, i32
  }
  func.func @transform_2(%arg0: i32, %arg1: i32) -> (i32, i32, i32, i32) {
    %c1_i32 = arith.constant 1 : i32
    %0 = arith.addi %arg1, %c1_i32 : i32
    %c4_i32 = arith.constant 4 : i32
    %1 = arith.muli %0, %c4_i32 : i32
    %c15_i32 = arith.constant 15 : i32
    %2 = arith.minsi %1, %c15_i32 : i32
    %c0_i32 = arith.constant 0 : i32
    %c0_i32_0 = arith.constant 0 : i32
    %c0_i32_1 = arith.constant 0 : i32
    return %arg0, %2, %c0_i32, %c0_i32_0 : i32, i32, i32, i32
  }
  func.func @transform_3(%arg0: i32, %arg1: i32) -> (i32, i32, i32) {
    %c0_i32 = arith.constant 0 : i32
    %c0_i32_0 = arith.constant 0 : i32
    %c0_i32_1 = arith.constant 0 : i32
    %c0_i32_2 = arith.constant 0 : i32
    return %c0_i32, %c0_i32_0, %c0_i32_1 : i32, i32, i32
  }
  func.func @transform_4(%arg0: i32, %arg1: i32) -> (i32, i32) {
    %c0_i32 = arith.constant 0 : i32
    %c0_i32_0 = arith.constant 0 : i32
    %c0_i32_1 = arith.constant 0 : i32
    return %c0_i32, %c0_i32_0 : i32, i32
  }
  func.func @transform_5(%arg0: i32, %arg1: i32) -> (i32, i32, i32) {
    %c0_i32 = arith.constant 0 : i32
    %c0_i32_0 = arith.constant 0 : i32
    return %arg0, %arg1, %c0_i32 : i32, i32, i32
  }
  func.func @transform_6(%arg0: i32, %arg1: i32) -> (i32, i32, i32, i32) {
    %c0_i32 = arith.constant 0 : i32
    %c0_i32_0 = arith.constant 0 : i32
    %c0_i32_1 = arith.constant 0 : i32
    return %arg0, %arg1, %c0_i32, %c0_i32_0 : i32, i32, i32, i32
  }
}

</mosaic_0001>

<bundles_post_ra>
// kernel: conv3x3.1
= control target key start
LH: loop header
LB: loop body
LE: loop exit
PB: predicated region body
PF: predicated region fallthrough
CT: control target
= control target key end

     0   :  { %s4356_s0 = inlined_call_operand.hbm [shape: f32[1,16,16,32], index: 0, kind: input, shape index: {}, may-alias: {0,1,2}]   ;;  %s4357_s1 = inlined_call_operand.hbm [shape: f32[1,16,16,32], index: 1, kind: input, shape index: {}, may-alias: {0,1,2}]   ;;  %s4358_s2 = inlined_call_operand.hbm [shape: f32[1,16,16,32], index: 2, kind: input, shape index: {}, may-alias: {0,1,2}]   ;;  %s4359_s3 = inlined_call_operand.hbm [shape: bf16[9,32,64], index: 3, kind: input, shape index: {}]   ;;  %s4360_s4 = inlined_call_operand.vmem [shape: f32[1,64], index: 4, kind: input, shape index: {}]   ;;  %s4361_s5 = inlined_call_operand.hbm [shape: f32[1,256,64], index: 5, kind: output, shape index: {0}]   ;;  %s4362_s6 = inlined_call_operand.vmem [shape: f32[1,4,2,64], index: 6, kind: output, shape index: {1}]  }
   0x1   :  { %4380 = sst [smem:[#allocation22_spill]] %s4356_s0 }
   0x2   :  { %4381 = sst [smem:[#allocation23_spill]] %s4357_s1 }
   0x3   :  { %4382 = sst [smem:[#allocation24_spill]] %s4358_s2 }
   0x4   :  { %4383 = sst [smem:[#allocation25_spill]] %s4359_s3 }
   0x5   :  { %4384 = sst [smem:[#allocation26_spill]] %s4360_s4 }
   0x6   :  { %4385 = sst [smem:[#allocation27_spill]] %s4361_s5 }
   0x7   :  { %4386 = sst [smem:[#allocation28_spill]] %s4362_s6 }
   0x8   :  { %12 = vsyncpa [#allocation4], 0 }
   0x9   :  { %14 = vsyncpa [#allocation4 + $0x1], 0 }
   0xa   :  { %15 = vsyncpa [#allocation7], 0 }
   0xb   :  { %17 = vsyncpa [#allocation7 + $0x1], 0 }
   0xc   :  { %18 = vsyncpa [#allocation10], 0 }
   0xd   :  { %19 = vsyncpa [#allocation5], 0 }
   0xe   :  { %21 = vsyncpa [#allocation5 + $0x1], 0  ;;  %s3397_s21 = smov 0   ;;  %s3399_s22 = smov 0  }
   0xf   :  { %s3401_s23 = smov 0   ;;  %s3403_s24 = smov 0  }
  0x10   :  { %s3405_s25 = smov 0   ;;  %s3407_s26 = smov 0  }
  0x11   :  { %s3409_s27 = smov 0   ;;  %s3411_s28 = smov 0  }
  0x12   :  { %s3413_s29 = smov 0   ;;  %s3415_s30 = smov 0  }
  0x13   :  { %s3417_s7 = smov 0   ;;  %s3419_s8 = smov 0  }
  0x14 LB: > { %4387 = sst [smem:[#allocation17_spill]] %s3336_s29  ;;  %s36_s9 = sadd.s32 1, %s3344_s7  ;;  %s3348_s8 = sphi %s3419_s8, %s27_s8   ;;  %s3344_s7 = sphi %s3417_s7, %s4458_s7   ;;  %s3340_s30 = sphi %s3415_s30, %s4448_s30   ;;  %s3336_s29 = sphi %s3413_s29, %s4447_s29   ;;  %s3332_s28 = sphi %s3411_s28, %s4457_s28   ;;  %s3328_s27 = sphi %s3409_s27, %s4456_s27   ;;  %s3324_s26 = sphi %s3407_s26, %s4455_s26   ;;  %s3320_s25 = sphi %s3405_s25, %s4454_s25   ;;  %s3316_s24 = sphi %s3403_s24, %s4453_s24   ;;  %s3312_s23 = sphi %s3401_s23, %s4452_s23   ;;  %s3308_s22 = sphi %s3399_s22, %s4451_s22   ;;  %s3304_s21 = sphi %s3397_s21, %s4450_s21  }
  0x15   : > { %4388 = sst [smem:[#allocation18_spill]] %s3340_s30  ;;  %p4368_p0 = scmp.eq.s32.totalorder %s3348_s8, 0 }
  0x16   : > { %4389 = sst [smem:[#allocation19_spill]] %s3344_s7  ;;  %p37_p1 = scmp.ge.s32.totalorder %s36_s9, 4 }
  0x17   : > { %s2516_s10 = sshll.u32 %s3344_s7, 2  ;;  %s84_s12 = sadd.s32 1, %s3324_s26 }
  0x18   : > { %s2517_s11 = sadd.s32 4294967295, %s2516_s10  ;;  %s4460_s9 = smov (%p37_p1, %s36_s9), 0 }
  0x19   : > { %4390 = sst [smem:[#allocation20_spill]] %s4460_s9  ;;  %p73_p2 = scmp.gt.s32.totalorder %s2517_s11, 0 }
  0x1a   : > { %p91_p3 = scmp.ne.s32.totalorder %s3324_s26, %s3320_s25  ;;  %s44_s13 = ssub.s32 %s3344_s7, %s4460_s9 }
  0x1b   : > { %s2518_s14 = sshll.u32 %s4460_s9, 2  ;;  %p3468_p4 = scmp.eq.s32.totalorder %s44_s13, 0 }
  0x1c   : > { %s2519_s16 = sadd.s32 4294967295, %s2518_s14  ;;  %s4462_s11 = smov (!%p73_p2, %s2517_s11), 0 }
  0x1d   : > { %s4391_s15 = scalar_select %p3468_p4, 1, 0 }
  0x1e   : > { %p77_p5 = scmp.gt.s32.totalorder %s2519_s16, 0  ;;  %p3474_p6 = por %p91_p3, %p4368_p0 }
  0x1f   : > { %s3480_s18 = sadd.s32 4, %s2516_s10  ;;  %s3483_s19 = sadd.s32 4, %s2518_s14 }
  0x20   : > { %s4464_s16 = smov (!%p77_p5, %s2519_s16), 0  ;;  %p4367_p11 = scmp.lt.s32.totalorder %s3348_s8, 4 }
  0x21   : > { %s80_s20 = ssub.s32 %s4462_s11, %s4464_s16  ;;  %s295_s9 = sand.u32 1, %s3348_s8  }
  0x22   : > { %p82_p10 = scmp.eq.s32.totalorder %s80_s20, 0  ;;  %s297_s5 = sand.u32 1, %s3324_s26  }
  0x23   : > { %s2529_s4 = sshll.u32 %s297_s5, 4  ;;  %s2673_s6 = sshll.u32 %s4462_s11, 8 }
  0x24   : > { %s3488_s13 = scalar_select %p82_p10, %s3324_s26, %s84_s12  }
  0x25   : > { %s4393_s1 = sld [smem:[#allocation23_spill]]  ;;  %s299_s14 = scalar_lea.vmem [#allocation6], %s2529_s4 }
  0x26   : > { %s312_s16 = sshll.u32 %s299_s14, 4  ;;  %p3501_p12 = pnand %p4367_p11, %p3474_p6  ;;  %s3505_s16 = int_to_ptr.vmem [resolvable:$true] %s312_s16 }
  0x27   : > { %s3507_s5 = scalar_lea.sflag [#allocation7], %s295_s9 }
  0x28   : > { %p3090_p1 = pneg %p3501_p12 }
  0x2b   : > { %s3495_s2 = scalar_lea.hbm %s4393_s1, %s2673_s6  ;;  %s3093_s11 = scalar_lea.hbm %s4393_s1, 4096 }
  0x2c   : > { %s3088_s6 = scalar_lea.hbm %s3495_s2, 256  ;;  %p3094_p5 = scmp.lt.u32.totalorder %s3495_s2, %s4393_s1 }
  0x2d   : > { %p3089_p13 = scmp.ne.s32.totalorder %s3495_s2, %s3088_s6  ;;  %p3095_p6 = scmp.lt.u32.totalorder %s3093_s11, %s3088_s6 }
  0x2e   : > { %p3097_p9 = scmp.lt.u32.totalorder %s3088_s6, %s3495_s2 }
  0x2f   : > { %p3091_p2 = pnand %p3090_p1, %p3089_p13  ;;  %p3096_p10 = por %p3095_p6, %p3094_p5 }
  0x31   : > { %p3092_p3 = pneg %p3091_p2  ;;  %p3098_p8 = por %p3097_p9, %p3096_p10 }
  0x33   : > { %p3099_p11 = pnand %p3098_p8, %p3092_p3 }
  0x35   : > { %3102 = shalt.err (!%p3099_p11)
}
  0x36   : > { %s3103_s9 = scalar_lea.vmem %s3505_s16, 256  ;;  %s3350_s10 = smov [#allocation6]  }
  0x37   : > { %p3104_p13 = scmp.ne.s32.totalorder %s3505_s16, %s3103_s9  ;;  %s3108_s14 = sshll.u32 %s3350_s10, 4  ;;  %s3109_s14 = int_to_ptr.vmem [resolvable:$false] %s3108_s14 }
  0x38   : > { %s3110_s4 = scalar_lea.vmem %s3109_s14, 512  ;;  %p3111_p7 = scmp.lt.s32.totalorder %s3505_s16, %s3109_s14 }
  0x39   : > { %p3106_p2 = pnand %p3104_p13, %p3090_p1  ;;  %p3112_p5 = scmp.lt.s32.totalorder %s3110_s4, %s3103_s9 }
  0x3b   : > { %p3107_p0 = pneg %p3106_p2  ;;  %p3113_p6 = por %p3112_p5, %p3111_p7 }
  0x3d   : > { %p3114_p9 = pnand %p3113_p6, %p3107_p0 }
  0x3f   : > { %3117 = shalt.err (!%p3114_p9)
}
  0x40   : > { %s4369_s6 = smov 128   ;;  %s4371_s30 = smov 8  }
  0x41   : > { %2942 = dma.hbm_to_vmem [thread:$0]  (!%p3501_p12), %s3495_s2, 256, %s3505_s16, %s3507_s5, %s4369_s6, %s4369_s6, %s4371_s30  }
  0x42   : > { %s3539_s11 = sadd.s32 4294967295, %s3348_s8   ;;  %p2522_p0 = scmp.ge.s32.totalorder %s3348_s8, 1 }
  0x43   : > { %p4373_p7 = scmp.eq.s32.totalorder %s3539_s11, 0  ;;  %p242_p11 = scmp.lt.s32.totalorder %s3348_s8, 5 }
  0x44   : > { %p4395_p1 = scmp.ne.s32.totalorder %s3320_s25, %s3316_s24  ;;  %s3353_s2 = smov [#allocation9]  }
  0x45   : > { %p3554_p10 = pnand %p2522_p0, %p242_p11  ;;  %s254_s16 = sshll.u32 %s3353_s2, 4  ;;  %s255_s16 = int_to_ptr.vmem [resolvable:$true] %s254_s16 }
  0x46   : > { %p3550_p3 = por %p4395_p1, %p4373_p7  ;;  %s4399_s3 = sld [smem:[#allocation25_spill]] }
  0x47   : > { %s4397_s12 = scalar_select %p3554_p10, 1, 0 }
  0x48   : > { %s4396_s17 = scalar_select %p3550_p3, 1, 0 }
  0x49   : > { %p2932_p12 = pneg %p3554_p10 }
  0x4b   : > { %p3562_p13 = pnand %p2932_p12, %p4373_p7 }
  0x4c   : > { %s3118_s10 = scalar_lea.hbm %s4399_s3, 2304 }
  0x4d   : > { %p3119_p2 = scmp.ne.s32.totalorder %s4399_s3, %s3118_s10  ;;  %p3120_p5 = pneg %p3562_p13 }
  0x4e   : > { %p3125_p0 = scmp.lt.u32.totalorder %s3118_s10, %s4399_s3 }
  0x4f   : > { %p3121_p6 = pnand %p3120_p5, %p3119_p2 }
  0x51   : > { %p3122_p9 = pneg %p3121_p6 }
  0x53   : > { %p3127_p11 = pnand %p3125_p0, %p3122_p9 }
  0x55   : > { %3130 = shalt.err (!%p3127_p11)
}
  0x56   : > { %s3131_s30 = scalar_lea.vmem %s255_s16, 2304  ;;  %p3139_p7 = scmp.lt.s32.totalorder %s255_s16, %s255_s16 }
  0x57   : > { %p3132_p1 = scmp.ne.s32.totalorder %s255_s16, %s3131_s30  ;;  %p3140_p3 = scmp.lt.s32.totalorder %s3131_s30, %s3131_s30 }
  0x59   : > { %p3134_p12 = pnand %p3132_p1, %p3120_p5  ;;  %p3141_p10 = por %p3140_p3, %p3139_p7 }
  0x5b   : > { %p3135_p8 = pneg %p3134_p12 }
  0x5d   : > { %p3142_p4 = pnand %p3141_p10, %p3135_p8 }
  0x5f   : > { %3145 = shalt.err (!%p3142_p4)
}
  0x60   : > { %s3354_s24 = smov 64   ;;  %s3355_s6 = smov 4  }
  0x61   : > { %2935 = dma.hbm_to_vmem [thread:$0]  (!%p3562_p13), %s4399_s3, 2304, %s255_s16, [#allocation10], %s3354_s24, %s3354_s24, %s3355_s6  }
  0x62   : > { %s2515_s10 = sadd.s32 4294967294, %s3348_s8   ;;  %s48_s14 = sadd.s32 1, %s3336_s29 }
  0x63   : > { %p4400_p4 = scmp.ne.s32.totalorder %s4391_s15, 0  ;;  %p55_p7 = scmp.ne.s32.totalorder %s3336_s29, %s3332_s28 }
  0x64   : > { %p61_p8 = scmp.ne.s32.totalorder %s3332_s28, %s3328_s27  ;;  %p207_p3 = scmp.eq.s32.totalorder %s2515_s10, 3 }
  0x65   : > { %s3587_s4 = scalar_select %p4400_p4, %s3336_s29, %s48_s14  }
  0x66   : > { %s271_s2 = sand.u32 1, %s3336_s29   ;;  %p4402_p10 = scmp.eq.s32.totalorder %s3348_s8, 0 }
  0x67   : > { %4401 = sst [smem:[#allocation21_spill]] %s3587_s4  ;;  %p4403_p5 = scmp.eq.s32.totalorder %s3539_s11, 0 }
  0x68   : > { %p57_p2 = por %p4402_p10, %p55_p7  ;;  %p4405_p9 = scmp.eq.s32.totalorder %s3539_s11, 3 }
  0x69   : > { %p3598_p6 = por %p4403_p5, %p61_p8  ;;  %p3608_p13 = por %p207_p3, %p61_p8 }
  0x6a   : > { %p3604_p0 = por %p4405_p9, %p55_p7  ;;  %s2525_s20 = sshll.u32 %s271_s2, 6 }
  0x6b   : > { %s4407_s15 = scalar_select %p3608_p13, 1, 0 }
  0x6c   : > { %s4406_s16 = scalar_select %p3604_p0, 1, 0 }
  0x6d   : > { %s2672_s24 = sshll.u32 %s3344_s7, 10  ;;  %s4408_s0 = sld [smem:[#allocation22_spill]] }
  0x6e   : > { %s275_s10 = scalar_lea.vmem [#allocation3], %s2525_s20  ;;  %p4409_p11 = scmp.lt.s32.totalorder %s3348_s8, 4 }
  0x6f   : > { %s285_s14 = sshll.u32 %s275_s10, 4  ;;  %s3626_s7 = scalar_lea.sflag [#allocation4], %s271_s2  ;;  %s3618_s14 = int_to_ptr.vmem [resolvable:$true] %s285_s14 }
  0x70   : > { %p3622_p1 = pnand %p4409_p11, %p57_p2 }
  0x72   : > { %p3148_p4 = pneg %p3622_p1 }
  0x73   : > { %s3616_s9 = scalar_lea.hbm %s4408_s0, %s2672_s24  ;;  %s3151_s30 = scalar_lea.hbm %s4408_s0, 4096 }
  0x74   : > { %s3146_s6 = scalar_lea.hbm %s3616_s9, 1024  ;;  %p3152_p3 = scmp.lt.u32.totalorder %s3616_s9, %s4408_s0 }
  0x75   : > { %p3147_p12 = scmp.ne.s32.totalorder %s3616_s9, %s3146_s6  ;;  %p3153_p10 = scmp.lt.u32.totalorder %s3151_s30, %s3146_s6 }
  0x76   : > { %p3155_p5 = scmp.lt.u32.totalorder %s3146_s6, %s3616_s9 }
  0x77   : > { %p3149_p7 = pnand %p3148_p4, %p3147_p12  ;;  %p3154_p2 = por %p3153_p10, %p3152_p3 }
  0x79   : > { %p3150_p8 = pneg %p3149_p7  ;;  %p3156_p9 = por %p3155_p5, %p3154_p2 }
  0x7b   : > { %p3157_p11 = pnand %p3156_p9, %p3150_p8 }
  0x7d   : > { %3160 = shalt.err (!%p3157_p11)
}
  0x7e   : > { %s3161_s2 = scalar_lea.vmem %s3618_s14, 1024  ;;  %s3356_s20 = smov [#allocation3]  }
  0x7f   : > { %p3162_p12 = scmp.ne.s32.totalorder %s3618_s14, %s3161_s2  ;;  %s3166_s24 = sshll.u32 %s3356_s20, 4  ;;  %s3167_s24 = int_to_ptr.vmem [resolvable:$false] %s3166_s24 }
  0x80   : > { %s3168_s4 = scalar_lea.vmem %s3167_s24, 2048  ;;  %p3169_p0 = scmp.lt.s32.totalorder %s3618_s14, %s3167_s24 }
  0x81   : > { %p3164_p7 = pnand %p3162_p12, %p3148_p4  ;;  %p3170_p3 = scmp.lt.s32.totalorder %s3168_s4, %s3161_s2 }
  0x83   : > { %p3165_p13 = pneg %p3164_p7  ;;  %p3171_p10 = por %p3170_p3, %p3169_p0 }
  0x85   : > { %p3172_p2 = pnand %p3171_p10, %p3165_p13 }
  0x87   : > { %3175 = shalt.err (!%p3172_p2)
}
  0x88   : > { %s4411_s6 = smov 8   ;;  %s4412_s30 = smov 128  }
  0x89   : > { %2939 = dma.hbm_to_vmem [thread:$0]  (!%p3622_p1), %s3616_s9, 1024, %s3618_s14, %s3626_s7, %s4412_s30, %s4412_s30, %s4411_s6  }
  0x8a   : > { %s120_s3 = sadd.s32 1, %s3312_s23  ;;  %p4413_p0 = scmp.lt.s32.totalorder %s3480_s18, 15 }
  0x8b   : > { %p4414_p13 = scmp.lt.s32.totalorder %s3483_s19, 15  ;;  %p127_p4 = scmp.ne.s32.totalorder %s3312_s23, %s3308_s22 }
  0x8c   : > { %s4466_s18 = smov (!%p4413_p0, %s3480_s18), 15  ;;  %p133_p8 = scmp.ne.s32.totalorder %s3308_s22, %s3304_s21 }
  0x8d   : > { %s4468_s19 = smov (!%p4414_p13, %s3483_s19), 15  ;;  %s324_s2 = sand.u32 1, %s3312_s23  }
  0x8e   : > { %s116_s10 = ssub.s32 %s4466_s18, %s4468_s19  ;;  %p4415_p9 = scmp.eq.s32.totalorder %s3348_s8, 0 }
  0x8f   : > { %p118_p5 = scmp.eq.s32.totalorder %s116_s10, 0  ;;  %p4416_p12 = scmp.eq.s32.totalorder %s3539_s11, 0 }
  0x90   : > { %p129_p11 = por %p127_p4, %p4415_p9  ;;  %s2534_s24 = sshll.u32 %s324_s2, 4 }
  0x91   : > { %p3673_p7 = por %p133_p8, %p4416_p12  ;;  %s2676_s9 = sshll.u32 %s4466_s18, 8 }
  0x92   : > { %s3678_s7 = scalar_select %p118_p5, %s3312_s23, %s120_s3  }
  0x93   : > { %s4417_s20 = scalar_select %p3673_p7, 1, 0 }
  0x94   : > { %s4418_s0 = sld [smem:[#allocation24_spill]]  ;;  %s326_s21 = scalar_lea.vmem [#allocation8], %s2534_s24 }
  0x95   : > { %s339_s19 = sshll.u32 %s326_s21, 4  ;;  %p4419_p1 = scmp.lt.s32.totalorder %s3348_s8, 4  ;;  %s3685_s19 = int_to_ptr.vmem [resolvable:$true] %s339_s19 }
  0x97   : > { %p3689_p3 = pnand %p4419_p1, %p129_p11 }
  0x99   : > { %p3178_p2 = pneg %p3689_p3 }
  0x9a   : > { %s3683_s29 = scalar_lea.hbm %s4418_s0, %s2676_s9  ;;  %s3181_s24 = scalar_lea.hbm %s4418_s0, 4096 }
  0x9b   : > { %s3176_s18 = scalar_lea.hbm %s3683_s29, 256  ;;  %p3182_p4 = scmp.lt.u32.totalorder %s3683_s29, %s4418_s0 }
  0x9c   : > { %p3177_p10 = scmp.ne.s32.totalorder %s3683_s29, %s3176_s18  ;;  %p3183_p8 = scmp.lt.u32.totalorder %s3181_s24, %s3176_s18 }
  0x9d   : > { %p3185_p9 = scmp.lt.u32.totalorder %s3176_s18, %s3683_s29 }
  0x9e   : > { %p3179_p0 = pnand %p3178_p2, %p3177_p10  ;;  %p3184_p5 = por %p3183_p8, %p3182_p4 }
  0xa0   : > { %p3180_p13 = pneg %p3179_p0  ;;  %p3186_p11 = por %p3185_p9, %p3184_p5 }
  0xa2   : > { %p3187_p12 = pnand %p3186_p11, %p3180_p13 }
  0xa4   : > { %3190 = shalt.err (!%p3187_p12)
}
  0xa5   : > { %s3191_s4 = scalar_lea.vmem %s3685_s19, 256  ;;  %s3357_s21 = smov [#allocation8]  }
  0xa6   : > { %p3192_p1 = scmp.ne.s32.totalorder %s3685_s19, %s3191_s4  ;;  %s3196_s3 = sshll.u32 %s3357_s21, 4  ;;  %s3197_s3 = int_to_ptr.vmem [resolvable:$false] %s3196_s3 }
  0xa7   : > { %s3198_s2 = scalar_lea.vmem %s3197_s3, 512  ;;  %p3199_p7 = scmp.lt.s32.totalorder %s3685_s19, %s3197_s3 }
  0xa8   : > { %p3194_p10 = pnand %p3192_p1, %p3178_p2  ;;  %p3200_p4 = scmp.lt.s32.totalorder %s3198_s2, %s3191_s4 }
  0xaa   : > { %p3195_p0 = pneg %p3194_p10  ;;  %p3201_p8 = por %p3200_p4, %p3199_p7 }
  0xac   : > { %p3202_p5 = pnand %p3201_p8, %p3195_p0 }
  0xae   : > { %3205 = shalt.err (!%p3202_p5)
}
  0xaf   : > { %2945 = dma.hbm_to_vmem [thread:$0]  (!%p3689_p3), %s3683_s29, 256, %s3685_s19, %s3507_s5, %s4412_s30, %s4412_s30, %s4411_s6  }
  0xb0   : > { %p4421_p2 = scmp.ne.s32.totalorder %s4397_s12, 0 }
  0xb1   : > { %s3725_s18 = sand.u32 (!%p4421_p2), 1, %s3332_s28  }
  0xb2   : > { %351 = sbr.rel (%p4421_p2) target bundleno = 603 (0x25b), region = 40  ;;  %s2539_s24 = sshll.u32 (!%p4421_p2), %s3725_s18, 6 }
  0xb3   : > { %s354_s9 = scalar_lea.sflag (!%p4421_p2), [#allocation4], %s3725_s18  ;;  %s3731_s10 = scalar_lea.vmem (!%p4421_p2), [#allocation3], %s2539_s24 }
  0xb9   : > { %3283 = dma.done.wait (%p3598_p6), %s354_s9, 1024  }
  0xba   : > { %3285 = vsyncadd (%p3598_p6), %s354_s9, 4294966272  ;;  %s362_s29 = sand.u32 1, %s3539_s11   ;;  %s364_s5 = sand.u32 1, %s3320_s25  }
  0xbb   : > { %s3739_s12 = sshll.u32 %s364_s5, 4  ;;  %s363_s6 = scalar_lea.sflag [#allocation7], %s362_s29 }
  0xbc   : > { %s366_s30 = scalar_lea.vmem [#allocation6], %s3739_s12  ;;  %p4422_p7 = scmp.ne.s32.totalorder %s4396_s17, 0 }
  0xbe   : > { %3287 = dma.done.wait (%p4422_p7), %s363_s6, 256  }
  0xbf   : > { %3289 = vsyncadd (%p4422_p7), %s363_s6, 4294967040  ;;  %s373_s19 = sand.u32 1, %s3308_s22   ;;  %p4423_p6 = scmp.ne.s32.totalorder %s4417_s20, 0 }
  0xc0   : > { %s3747_s1 = sshll.u32 %s373_s19, 4 }
  0xc1   : > { %s375_s14 = scalar_lea.vmem [#allocation8], %s3747_s1 }
  0xc2   : > { %3291 = dma.done.wait (%p4423_p6), %s363_s6, 256  }
  0xc3   : > { %3293 = vsyncadd (%p4423_p6), %s363_s6, 4294967040  ;;  %p4424_p3 = scmp.eq.s32.totalorder %s3539_s11, 0 }
  0xc5   : > { %3295 = dma.done.wait (%p4424_p3), [#allocation10], 2304   ;;  %p4425_p13 = pmov %p4424_p3 }
  0xc6   : > { %s4426_s17 = sld [smem:[#allocation18_spill]]  ;;  %vm486_vm0 = vcmask 257024   ;;  %vm445_vm1 = vcmask 253952   ;;  %vm446_vm2 = vsmask.f32 256  ;;  %v3358_v0 = vmov 0  }
  0xc7   : > { %3297 = vsyncadd (%p4425_p13), [#allocation10], 4294964992  ;;  %488 = vst.msk [vmem:[#allocation2 + $0x4] sm:$0xf] %vm486_vm0, %v3358_v0  ;;  %vm466_vm3 = vsmask.f32 7938 }
  0xc8   : > { %493 = vst.msk [vmem:[#allocation2 + $0x40] sm:$0xf] %vm486_vm0, %v3358_v0  ;;  %vm3766_vm4 = vmand %vm445_vm1, %vm446_vm2  ;;  %s4431_s3 = sld [smem:[#allocation28_spill]]  ;;  %vm527_vm6 = vsmask.f32 4368  ;;  %v495_v10 = vld [vmem:[%s3731_s10] sm:$0xff] }
  0xc9   : > { %vm3772_vm5 = vmand %vm445_vm1, %vm466_vm3  ;;  %v451_v3 = vld [vmem:[#allocation2 + $0xc] sm:$0x1]  ;;  %v454_v4 = vld [vmem:[#allocation2 + $0x18] sm:$0x1]  ;;  %v2677_v14 = vpack.c.bf16 %v495_v10, %v495_v10  ;;  %s3863_s9 = scalar_lea.vmem [#allocation11], %s2539_s24 }
  0xca   : > { %v457_v5 = vld [vmem:[#allocation2 + $0x24] sm:$0x1]  ;;  %v452_v6 = vsel %vm3766_vm4, 0, %v451_v3  ;;  %v455_v7 = vsel %vm3766_vm4, 0, %v454_v4  ;;  %v460_v9 = vld [vmem:[#allocation2 + $0x30] sm:$0x1]  ;;  %vm3823_vm7 = vmand %vm486_vm0, %vm466_vm3 }
  0xcb   : > { %v458_v8 = vsel %vm3766_vm4, 0, %v457_v5  ;;  %453 = vst [vmem:[#allocation2 + $0xc] sm:$0x1] %v452_v6  ;;  %456 = vst [vmem:[#allocation2 + $0x18] sm:$0x1] %v455_v7  ;;  %v461_v11 = vsel %vm3766_vm4, 0, %v460_v9 }
  0xcc   : > { %p438_p9 = scmp.lt.s32.totalorder %s4426_s17, 3  ;;  %459 = vst [vmem:[#allocation2 + $0x24] sm:$0x1] %v458_v8  ;;  %v471_v12 = vld [vmem:[#allocation2 + $0x14] sm:$0x1]  ;;  %v530_v31 = vshrl.u32 %v2677_v14, 16  ;;  %vm3829_vm8 = vmor %vm446_vm2, %vm527_vm6 }
  0xcd   : > { %v474_v13 = vld [vmem:[#allocation2 + $0x20] sm:$0x1]  ;;  %v496_v15 = vld [vmem:[%s3731_s10 + $0x8] sm:$0xff]  ;;  %462 = vst [vmem:[#allocation2 + $0x30] sm:$0x1] %v461_v11  ;;  %v472_v16 = vsel %vm3772_vm5, 0, %v471_v12 }
  0xce   : > { %s439_s20 = scalar_select %p438_p9, %s4426_s17, 3  ;;  %v475_v17 = vsel %vm3772_vm5, 0, %v474_v13  ;;  %v477_v18 = vld [vmem:[#allocation2 + $0x2c] sm:$0x1]  ;;  %v480_v19 = vld [vmem:[#allocation2 + $0x38] sm:$0x1]  ;;  %v2678_v20 = vpack.c.bf16 %v496_v15, %v496_v15 }
  0xcf   : > { %473 = vst [vmem:[#allocation2 + $0x14] sm:$0x1] %v472_v16  ;;  %476 = vst [vmem:[#allocation2 + $0x20] sm:$0x1] %v475_v17  ;;  %v478_v21 = vsel %vm3772_vm5, 0, %v477_v18  ;;  %v481_v22 = vsel %vm3772_vm5, 0, %v480_v19 }
  0xd0   : > { %s2544_s11 = sshll.u32 %s439_s20, 1  ;;  %v448_v23 = vld [vmem:[#allocation2] sm:$0x1]  ;;  %v463_v24 = vld [vmem:[#allocation2 + $0x3c] sm:$0x1]  ;;  %v533_v32 = vshll.u32 %v2677_v14, 16 }
  0xd1   : > { %s3779_s2 = scalar_lea.vmem %s4431_s3, %s2544_s11  ;;  %479 = vst [vmem:[#allocation2 + $0x2c] sm:$0x1] %v478_v21  ;;  %482 = vst [vmem:[#allocation2 + $0x38] sm:$0x1] %v481_v22  ;;  %v449_v25 = vsel %vm3766_vm4, 0, %v448_v23  ;;  %v464_v26 = vsel %vm3766_vm4, 0, %v463_v24 }
  0xd2   : > { %v468_v27 = vld [vmem:[#allocation2 + $0x8] sm:$0x1]  ;;  %v483_v28 = vld [vmem:[#allocation2 + $0x44] sm:$0x1]  ;;  %450 = vst [vmem:[#allocation2] sm:$0x1] %v449_v25 }
  0xd3   : > { %465 = vst [vmem:[#allocation2 + $0x3c] sm:$0x1] %v464_v26  ;;  %v469_v29 = vsel %vm3772_vm5, 0, %v468_v27  ;;  %v484_v30 = vsel %vm3772_vm5, 0, %v483_v28  ;;  %v497_v33 = vld [vmem:[%s3731_s10 + $0x10] sm:$0xff]  ;;  %v498_v34 = vld [vmem:[%s3731_s10 + $0x18] sm:$0xff] }
  0xd4   : > { %470 = vst [vmem:[#allocation2 + $0x8] sm:$0x1] %v469_v29  ;;  %485 = vst [vmem:[#allocation2 + $0x44] sm:$0x1] %v484_v30  ;;  %v538_v35 = vshrl.u32 %v2678_v20, 16  ;;  %v541_v36 = vshll.u32 %v2678_v20, 16  ;;  %v2679_v37 = vpack.c.bf16 %v497_v33, %v497_v33  ;;  %v2680_v38 = vpack.c.bf16 %v498_v34, %v498_v34 }
  0xd5   : > { %487 = vst.msk [vmem:[#allocation2] sm:$0xf] %vm486_vm0, %v3358_v0  ;;  %492 = vst.msk [vmem:[#allocation2 + $0x3c] sm:$0xf] %vm486_vm0, %v3358_v0  ;;  %v499_v39 = vld [vmem:[%s3731_s10 + $0x20] sm:$0xff]  ;;  %v500_v40 = vld [vmem:[%s3731_s10 + $0x28] sm:$0xff] }
  0xd6   : > { %v501_v41 = vld [vmem:[%s3731_s10 + $0x30] sm:$0xff]  ;;  %490 = vst.msk [vmem:[#allocation2 + $0x8] sm:$0x1] %vm445_vm1, %v3358_v0  ;;  %494 = vst.msk [vmem:[#allocation2 + $0x44] sm:$0x1] %vm445_vm1, %v3358_v0  ;;  %v532_v42 = vrot.slane %v530_v31, 7  ;;  %v2681_v43 = vpack.c.bf16 %v499_v39, %v499_v39  ;;  %v2682_v44 = vpack.c.bf16 %v500_v40, %v500_v40 }
  0xd7   : > { %v2683_v45 = vpack.c.bf16 %v501_v41, %v501_v41  ;;  %v502_v46 = vld [vmem:[%s3731_s10 + $0x38] sm:$0xff]  ;;  %v612_v48 = vld [vmem:[#allocation2 + $0xc] sm:$0xf]  ;;  %v540_v49 = vrot.slane %v538_v35, 7  ;;  %v547_v50 = vshrl.u32 %v2679_v37, 16  ;;  %v550_v51 = vshll.u32 %v2679_v37, 16 }
  0xd8   : > { %v555_v52 = vshrl.u32 %v2680_v38, 16  ;;  %v535_v53 = vor.u32 %v533_v32, %v532_v42  ;;  %v536_v55 = vrot.slane %v532_v42, 4  ;;  %v558_v56 = vshll.u32 %v2680_v38, 16  ;;  %v616_v60 = vld [vmem:[#allocation2 + $0x14] sm:$0x1]  ;;  %p2553_p11 = scmp.le.s32.totalorder %s4426_s17, 0 }
  0xd9   : > { %v564_v57 = vshrl.u32 %v2681_v43, 16  ;;  %v543_v58 = vor.u32 %v541_v36, %v540_v49  ;;  %v545_v59 = vrot.slane %v540_v49, 4  ;;  %v549_v61 = vrot.slane %v547_v50, 7  ;;  %v619_v0 = vld [vmem:[#allocation2 + $0x18] sm:$0xf] }
  0xda   : > { %v557_v62 = vrot.slane %v555_v52, 7  ;;  %v613_v63 = vsel %vm3823_vm7, %v535_v53, %v612_v48  ;;  %v567_v3 = vshll.u32 %v2681_v43, 16  ;;  %v2684_v4 = vpack.c.bf16 %v502_v46, %v502_v46  ;;  %v623_v9 = vld [vmem:[#allocation2 + $0x20] sm:$0x1]  ;;  %v626_v10 = vld [vmem:[#allocation2 + $0x24] sm:$0xf] }
  0xdb   : > { %v566_v2 = vrot.slane %v564_v57, 7  ;;  %614 = vst [vmem:[#allocation2 + $0xc] sm:$0xf] %v613_v63  ;;  %v544_v5 = vsel %vm3829_vm8, %v536_v55, %v543_v58  ;;  %v617_v6 = vsel %vm3766_vm4, %v545_v59, %v616_v60  ;;  %v552_v7 = vor.u32 %v550_v51, %v549_v61  ;;  %v630_v26 = vld [vmem:[#allocation2 + $0x2c] sm:$0x1]  ;;  %v645_v43 = vld [vmem:[%s366_s30 + $0x8] sm:$0xff] (!%p2553_p11) }
  0xdc   : > { %v553_v8 = vrot.slane %v549_v61, 4  ;;  %615 = vst.msk [vmem:[#allocation2 + $0x10] sm:$0xf] %vm486_vm0, %v544_v5  ;;  %618 = vst [vmem:[#allocation2 + $0x14] sm:$0x1] %v617_v6  ;;  %v560_v11 = vor.u32 %v558_v56, %v557_v62  ;;  %v562_v12 = vrot.slane %v557_v62, 4 }
  0xdd   : > { %v569_v13 = vor.u32 %v567_v3, %v566_v2  ;;  %v620_v14 = vsel %vm3823_vm7, %v552_v7, %v619_v0  ;;  %v572_v15 = vshrl.u32 %v2682_v44, 16  ;;  %v575_v16 = vshll.u32 %v2682_v44, 16  ;;  %v633_v27 = vld [vmem:[#allocation2 + $0x30] sm:$0xf]  ;;  %v637_v37 = vld [vmem:[#allocation2 + $0x38] sm:$0x1] }
  0xde   : > { %v581_v17 = vshrl.u32 %v2683_v45, 16  ;;  %621 = vst [vmem:[#allocation2 + $0x18] sm:$0xf] %v620_v14  ;;  %v561_v18 = vsel %vm3829_vm8, %v553_v8, %v560_v11  ;;  %v624_v19 = vsel %vm3766_vm4, %v562_v12, %v623_v9  ;;  %v584_v21 = vshll.u32 %v2683_v45, 16  ;;  %v644_v42 = vld [vmem:[%s366_s30] sm:$0xff] (!%p2553_p11) }
  0xdf   : > { %v627_v20 = vsel %vm3823_vm7, %v569_v13, %v626_v10  ;;  %622 = vst.msk [vmem:[#allocation2 + $0x1c] sm:$0xf] %vm486_vm0, %v561_v18  ;;  %625 = vst [vmem:[#allocation2 + $0x20] sm:$0x1] %v624_v19  ;;  %v570_v22 = vrot.slane %v566_v2, 4  ;;  %v574_v23 = vrot.slane %v572_v15, 7  ;;  %v2685_v44 = vpack.c.bf16 (!%p2553_p11), %v644_v42, %v644_v42 }
  0xe0   : > { %628 = vst [vmem:[#allocation2 + $0x24] sm:$0xf] %v627_v20  ;;  %v583_v24 = vrot.slane %v581_v17, 7  ;;  %v589_v25 = vshrl.u32 %v2684_v4, 16  ;;  %v592_v28 = vshll.u32 %v2684_v4, 16  ;;  %v2686_v45 = vpack.c.bf16 (!%p2553_p11), %v645_v43, %v645_v43 }
  0xe1   : > { %v577_v29 = vor.u32 %v575_v16, %v574_v23  ;;  %v579_v30 = vrot.slane %v574_v23, 4  ;;  %643 = sbr.rel (%p2553_p11) target bundleno = 234 (0xea), region = 60  ;;  %v653_v46 = vshrl.u32 (!%p2553_p11), %v2685_v44, 16  ;;  %v656_v48 = vshll.u32 (!%p2553_p11), %v2685_v44, 16  ;;  %v672_v53 = vld [vmem:[#allocation2] sm:$0xf] (!%p2553_p11) }
  0xe2   : > { %v586_v31 = vor.u32 %v584_v21, %v583_v24  ;;  %v587_v32 = vrot.slane %v583_v24, 4  ;;  %v591_v33 = vrot.slane %v589_v25, 7  ;;  %v661_v49 = vshrl.u32 (!%p2553_p11), %v2686_v45, 16  ;;  %v676_v55 = vld [vmem:[#allocation2 + $0x8] sm:$0x1] (!%p2553_p11) }
  0xe3   : > { %v578_v34 = vsel %vm3829_vm8, %v570_v22, %v577_v29  ;;  %v631_v35 = vsel %vm3766_vm4, %v579_v30, %v630_v26  ;;  %v664_v50 = vshll.u32 (!%p2553_p11), %v2686_v45, 16  ;;  %v655_v51 = vrot.slane (!%p2553_p11), %v653_v46, 7 }
  0xe4   : > { %v634_v36 = vsel %vm3823_vm7, %v586_v31, %v633_v27  ;;  %629 = vst.msk [vmem:[#allocation2 + $0x28] sm:$0xf] %vm486_vm0, %v578_v34  ;;  %632 = vst [vmem:[#allocation2 + $0x2c] sm:$0x1] %v631_v35  ;;  %v594_v38 = vor.u32 %v592_v28, %v591_v33  ;;  %v596_v39 = vrot.slane %v591_v33, 4  ;;  %v663_v52 = vrot.slane (!%p2553_p11), %v661_v49, 7 }
  0xe5   : > { %635 = vst [vmem:[#allocation2 + $0x30] sm:$0xf] %v634_v36  ;;  %v658_v56 = vor.u32 (!%p2553_p11), %v656_v48, %v655_v51  ;;  %v659_v57 = vrot.slane (!%p2553_p11), %v655_v51, 4 }
  0xe6   : > { %v595_v40 = vsel %vm3829_vm8, %v587_v32, %v594_v38  ;;  %v638_v41 = vsel %vm3766_vm4, %v596_v39, %v637_v37  ;;  %v666_v58 = vor.u32 (!%p2553_p11), %v664_v50, %v663_v52  ;;  %v668_v59 = vrot.slane (!%p2553_p11), %v663_v52, 4 }
  0xe7   : > { %636 = vst.msk [vmem:[#allocation2 + $0x34] sm:$0xf] %vm486_vm0, %v595_v40  ;;  %639 = vst [vmem:[#allocation2 + $0x38] sm:$0x1] %v638_v41  ;;  %v673_v60 = vsel (!%p2553_p11), %vm3823_vm7, %v658_v56, %v672_v53 }
  0xe8   : > { %v667_v61 = vsel %vm3829_vm8, %v659_v57, %v666_v58  ;;  %v677_v62 = vsel %vm3766_vm4, %v668_v59, %v676_v55  ;;  %674 = vst [vmem:[#allocation2] sm:$0xf] %v673_v60 }
  0xe9   : > { %675 = vst.msk [vmem:[#allocation2 + $0x4] sm:$0xf] %vm486_vm0, %v667_v61  ;;  %678 = vst [vmem:[#allocation2 + $0x8] sm:$0x1] %v677_v62 }
  0xea PF: > { %s4436_s24 = sld [smem:[#allocation18_spill]] }
  0xf0   : > { %p2556_p12 = scmp.ge.s32.totalorder %s4436_s24, 3 }
  0xf1   : > { %v683_v63 = vld [vmem:[%s375_s14] sm:$0xff] (!%p2556_p12)  ;;  %v684_v0 = vld [vmem:[%s375_s14 + $0x8] sm:$0xff] (!%p2556_p12) }
  0xf2   : > { %682 = sbr.rel (%p2556_p12) target bundleno = 253 (0xfd), region = 64  ;;  %v2687_v2 = vpack.c.bf16 (!%p2556_p12), %v683_v63, %v683_v63  ;;  %v2688_v3 = vpack.c.bf16 (!%p2556_p12), %v684_v0, %v684_v0  ;;  %v711_v10 = vld [vmem:[#allocation2 + $0x3c] sm:$0xf] (!%p2556_p12)  ;;  %v715_v11 = vld [vmem:[#allocation2 + $0x44] sm:$0x1] (!%p2556_p12) }
  0xf4   : > { %v692_v4 = vshrl.u32 (!%p2556_p12), %v2687_v2, 16  ;;  %v695_v5 = vshll.u32 (!%p2556_p12), %v2687_v2, 16  ;;  %v700_v6 = vshrl.u32 (!%p2556_p12), %v2688_v3, 16  ;;  %v703_v7 = vshll.u32 (!%p2556_p12), %v2688_v3, 16 }
  0xf6   : > { %v694_v8 = vrot.slane (!%p2556_p12), %v692_v4, 7  ;;  %v702_v9 = vrot.slane (!%p2556_p12), %v700_v6, 7 }
  0xf8   : > { %v697_v12 = vor.u32 (!%p2556_p12), %v695_v5, %v694_v8  ;;  %v698_v13 = vrot.slane (!%p2556_p12), %v694_v8, 4  ;;  %v705_v14 = vor.u32 (!%p2556_p12), %v703_v7, %v702_v9  ;;  %v707_v15 = vrot.slane (!%p2556_p12), %v702_v9, 4 }
  0xfa   : > { %v712_v16 = vsel %vm3823_vm7, %v697_v12, %v711_v10  ;;  %v706_v17 = vsel %vm3829_vm8, %v698_v13, %v705_v14  ;;  %v716_v18 = vsel %vm3766_vm4, %v707_v15, %v715_v11 }
  0xfb   : > { %713 = vst [vmem:[#allocation2 + $0x3c] sm:$0xf] %v712_v16  ;;  %714 = vst.msk [vmem:[#allocation2 + $0x40] sm:$0xf] %vm486_vm0, %v706_v17 }
  0xfc   : > { %717 = vst [vmem:[#allocation2 + $0x44] sm:$0x1] %v716_v18 }
  0xfd PF: > { %v3058_v19 = vld [vmem:[#allocation9 + $0x10] sm:$0xff]   ;;  %v3889_v20 = vld [vmem:[#allocation9 + $0x40] sm:$0xff]   ;;  %v3060_v21 = vld [vmem:[#allocation9 + $0x18] sm:$0xff]   ;;  %vm734_vm9 = vsmask.f32 3328  ;;  %vm862_vm12 = vcmask 261120  }
  0xfe   : > { %2744 = vmatprep.subr.bf16.mxu1 %v3058_v19  ;;  %2792 = vmatprep.subr.bf16.mxu0 %v3889_v20  ;;  %v3892_v47 = vld [vmem:[#allocation9 + $0x48] sm:$0xff]   ;;  %v3895_v1 = vld [vmem:[#allocation2] sm:$0xf]  ;;  %v3897_v54 = vld [vmem:[#allocation2 + $0x4] sm:$0xf]  ;;  %vm1061_vm13 = vcmask 1042432  }
  0xff   : > { %2745 = vmatpush3.bf16.msra.mxu1 %v3058_v19  ;;  %2793 = vmatpush3.bf16.msra.mxu0 %v3889_v20  ;;  %v3899_v22 = vld [vmem:[#allocation2 + $0x8] sm:$0x1]  ;;  %vm735_vm10 = vsmask.f32 7440  ;;  %v738_v23 = vshrl.u32 %v3895_v1, 16  ;;  %v741_v24 = vshll.u32 %v3895_v1, 16 }
 0x100   : > { %2746 = vmatprep.subr.bf16.mxu1 %v3060_v21  ;;  %2794 = vmatprep.subr.bf16.mxu0 %v3892_v47  ;;  %v747_v25 = vshll.u32 %v3897_v54, 16  ;;  %v751_v26 = vshrl.u32 %v3897_v54, 16  ;;  %v757_v27 = vshll.u32 %v3899_v22, 16  ;;  %v3907_v30 = vld [vmem:[#allocation9] sm:$0xff]   ;;  %v3909_v31 = vld [vmem:[#allocation9 + $0x50] sm:$0xff]   ;;  %vm3920_vm11 = vmor %vm734_vm9, %vm735_vm10  ;;  %vm1062_vm14 = vcmask 1046532  }
 0x101   : > { %v740_v28 = vrot.slane %v738_v23, 4  ;;  %v743_v29 = vrot.slane %v741_v24, 5  ;;  %v1336_v35 = vld [vmem:[#allocation2 + $0xc] sm:$0xf]  ;;  %v3913_v37 = vld [vmem:[#allocation2 + $0x10] sm:$0xf]  ;;  %vm3993_vm15 = vmor %vm1061_vm13, %vm1062_vm14 }
 0x102   : > { %v749_v32 = vrot.slane %v747_v25, 5  ;;  %v753_v33 = vrot.slane %v751_v26, 4  ;;  %v759_v34 = vrot.slane %v757_v27, 5  ;;  %v3915_v38 = vld [vmem:[#allocation2 + $0x14] sm:$0x1]  ;;  %v1349_v39 = vshrl.u32 %v1336_v35, 16 }
 0x103   : > { %2747 = vmatpush3.bf16.msra.mxu1 %v3060_v21  ;;  %2795 = vmatpush3.bf16.msra.mxu0 %v3892_v47  ;;  %v744_v36 = vor.u32 %v743_v29, %v740_v28  ;;  %v1352_v40 = vshll.u32 %v1336_v35, 16  ;;  %v1358_v43 = vshll.u32 %v3913_v37, 16  ;;  %v1362_v44 = vshrl.u32 %v3913_v37, 16  ;;  %v3928_v55 = vld [vmem:[#allocation2 + $0xc] sm:$0xf]  ;;  %s4441_s5 = sld [smem:[#allocation26_spill]] }
 0x104   : > { %2756 = vmatprep.subr.bf16.mxu1 %v3907_v30  ;;  %2804 = vmatprep.subr.bf16.mxu0 %v3909_v31  ;;  %v754_v42 = vor.u32 %v753_v33, %v749_v32  ;;  %v1368_v45 = vshll.u32 %v3915_v38, 16  ;;  %v1351_v48 = vrot.slane %v1349_v39, 4  ;;  %v1576_v53 = vrot.slane %v3913_v37, 5  ;;  %v3932_v59 = vld [vmem:[#allocation2 + $0x10] sm:$0xf]  ;;  %s4442_s12 = sld [smem:[#allocation18_spill]] }
 0x105   : > { %v745_v46 = vrot.slane %v744_v36, 4  ;;  %v1354_v49 = vrot.slane %v1352_v40, 5  ;;  %v1360_v51 = vrot.slane %v1358_v43, 5  ;;  %v1364_v52 = vrot.slane %v1362_v44, 4  ;;  %v3934_v60 = vld [vmem:[#allocation2 + $0x14] sm:$0x1] }
 0x106   : > { %v755_v50 = vrot.slane %v754_v42, 4  ;;  %v1370_v58 = vrot.slane %v1368_v45, 5  ;;  %v762_v61 = vshrl.u32 %v3928_v55, 16  ;;  %v765_v0 = vshll.u32 %v3928_v55, 16  ;;  %v1339_v3 = vld [vmem:[#allocation2 + $0x18] sm:$0xf] }
 0x107   : > { %v750_v56 = vsel %vm3920_vm11, %v745_v46, %v749_v32  ;;  %v1355_v57 = vor.u32 %v1354_v49, %v1351_v48  ;;  %v1365_v63 = vor.u32 %v1364_v52, %v1360_v51  ;;  %v771_v2 = vshll.u32 %v3932_v59, 16  ;;  %v3942_v8 = vld [vmem:[#allocation2 + $0x1c] sm:$0xf]  ;;  %v3949_v16 = vld [vmem:[#allocation2 + $0x20] sm:$0x1]  ;;  %v3065_v48 = vld [vmem:[#allocation9 + $0x8] sm:$0xff]  }
 0x108   : > { %v760_v62 = vsel %vm3920_vm11, %v755_v50, %v759_v34  ;;  %v764_v6 = vrot.slane %v762_v61, 4  ;;  %v775_v7 = vshrl.u32 %v3932_v59, 16  ;;  %v767_v10 = vrot.slane %v765_v0, 5  ;;  %v3953_v23 = vld [vmem:[#allocation2 + $0x18] sm:$0xf]  ;;  %s2329_s30 = sshll.u32 %s3863_s9, 4  ;;  %s4275_s30 = int_to_ptr.vmem [resolvable:$true] %s2329_s30 }
 0x109   : > { %v2559_v4 = vcombine.low %v750_v56, %v760_v62  ;;  %v1356_v5 = vrot.slane %v1355_v57, 4  ;;  %v1366_v9 = vrot.slane %v1365_v63, 4  ;;  %v773_v11 = vrot.slane %v771_v2, 5  ;;  %v3956_v28 = vld [vmem:[#allocation2 + $0x1c] sm:$0xf]  ;;  %s4443_s14 = sld [smem:[#allocation27_spill]] }
 0x10a   : > { %v781_v12 = vshll.u32 %v3934_v60, 16  ;;  %v1579_v14 = vrot.slane %v3915_v38, 5  ;;  %v777_v15 = vrot.slane %v775_v7, 4  ;;  %v768_v18 = vor.u32 %v767_v10, %v764_v6  ;;  %v3964_v45 = vld [vmem:[#allocation2 + $0x20] sm:$0x1]  ;;  %s2689_s6 = sshll.u32 %s4442_s12, 10 }
 0x10b   : > { %2748 = vmatprep.mubr.msk.bf16.mxu1 %vm862_vm12, %v2559_v4  ;;  %v1361_v13 = vsel %vm3920_vm11, %v1356_v5, %v1360_v51  ;;  %v1371_v17 = vsel %vm3920_vm11, %v1366_v9, %v1370_v58  ;;  %v1373_v21 = vshrl.u32 %v1339_v3, 16  ;;  %v1376_v26 = vshll.u32 %v1339_v3, 16  ;;  %v3971_v56 = vld [vmem:[#allocation2 + $0x24] sm:$0xf]  ;;  %v3973_v57 = vld [vmem:[#allocation2 + $0x28] sm:$0xf] }
 0x10c   : > { %v783_v19 = vrot.slane %v781_v12, 5  ;;  %v2603_v24 = vcombine.low %v1361_v13, %v1371_v17  ;;  %v778_v25 = vor.u32 %v777_v15, %v773_v11  ;;  %v1382_v27 = vshll.u32 %v3942_v8, 16  ;;  %v3977_v5 = vld [vmem:[#allocation2 + $0x2c] sm:$0x1]  ;;  %v1558_v17 = vld [vmem:[#allocation2 + $0xc] sm:$0xe] }
 0x10d   : > { %v769_v29 = vrot.slane %v768_v18, 4  ;;  %v1375_v32 = vrot.slane %v1373_v21, 4  ;;  %v1386_v33 = vshrl.u32 %v3942_v8, 16  ;;  %v1392_v34 = vshll.u32 %v3949_v16, 16  ;;  %v4026_v38 = vld [vmem:[#allocation2 + $0x38] sm:$0x1] }
 0x10e   : > { %2796 = vmatprep.mubr.msk.bf16.mxu0 %vm862_vm12, %v2603_v24  ;;  %v779_v35 = vrot.slane %v778_v25, 4  ;;  %v1378_v36 = vrot.slane %v1376_v26, 5  ;;  %v1384_v39 = vrot.slane %v1382_v27, 5  ;;  %v1586_v40 = vrot.slane %v3949_v16, 5  ;;  %v1559_v25 = vld [vmem:[#allocation2 + $0x18] sm:$0xe] }
 0x10f   : > { %v774_v42 = vsel %vm3920_vm11, %v769_v29, %v773_v11  ;;  %v1388_v43 = vrot.slane %v1386_v33, 4  ;;  %v1394_v44 = vrot.slane %v1392_v34, 5  ;;  %v786_v46 = vshrl.u32 %v3953_v23, 16  ;;  %v3988_v26 = vld [vmem:[#allocation9 + $0x20] sm:$0xff]   ;;  %s4273_s17 = scalar_lea.hbm %s4443_s14, %s2689_s6  ;;  %s2306_s20 = scalar_lea.sflag [#allocation5], %s3725_s18 }
 0x110   : > { %v784_v49 = vsel %vm3920_vm11, %v779_v35, %v783_v19  ;;  %v1379_v50 = vor.u32 %v1378_v36, %v1375_v32  ;;  %v789_v51 = vshll.u32 %v3953_v23, 16  ;;  %v795_v52 = vshll.u32 %v3956_v28, 16  ;;  %s3206_s11 = scalar_lea.vmem %s4275_s30, 1024  ;;  %p4444_p10 = scmp.ne.s32.totalorder %s4406_s16, 0 }
 0x111   : > { %v2560_v58 = vcombine.low %v774_v42, %v784_v49  ;;  %v1389_v61 = vor.u32 %v1388_v43, %v1384_v39  ;;  %v788_v62 = vrot.slane %v786_v46, 4  ;;  %v799_v63 = vshrl.u32 %v3956_v28, 16  ;;  %p3207_p1 = scmp.ne.s32.totalorder %s4275_s30, %s3206_s11  ;;  %s3359_s4 = smov [#allocation11]  }
 0x112   : > { %v1380_v0 = vrot.slane %v1379_v50, 4  ;;  %v791_v2 = vrot.slane %v789_v51, 5  ;;  %v797_v3 = vrot.slane %v795_v52, 5  ;;  %v805_v4 = vshll.u32 %v3964_v45, 16  ;;  %v1560_v50 = vld [vmem:[#allocation2 + $0x24] sm:$0xe] }
 0x113   : > { %2749 = vmatmul.mubr.msk.bf16.vlgmr.msra.gmra.mrb[0].mxu1 %vm862_vm12, %v2560_v58  ;;  %v1390_v6 = vrot.slane %v1389_v61, 4  ;;  %v801_v7 = vrot.slane %v799_v63, 4  ;;  %v810_v9 = vshrl.u32 %v3971_v56, 16  ;;  %v813_v10 = vshll.u32 %v3971_v56, 16  ;;  %p3208_p0 = pnand %p3207_p1, %p4444_p10  ;;  %s3210_s21 = sshll.u32 %s3359_s4, 4  ;;  %s3211_s21 = int_to_ptr.vmem [resolvable:$false] %s3210_s21 }
 0x114   : > { %2757 = vmatpush3.bf16.msra.mxu1 %v3907_v30  ;;  %v1385_v11 = vsel %vm3920_vm11, %v1380_v0, %v1384_v39  ;;  %v792_v12 = vor.u32 %v791_v2, %v788_v62  ;;  %v807_v13 = vrot.slane %v805_v4, 5  ;;  %v819_v15 = vshll.u32 %v3973_v57, 16  ;;  %v3064_v30 = vld [vmem:[#allocation9 + $0x58] sm:$0xff]   ;;  %v4013_v62 = vld [vmem:[#allocation2 + $0x2c] sm:$0x1]  ;;  %s3212_s3 = scalar_lea.vmem %s3211_s21, 2048  ;;  %p3213_p8 = scmp.lt.s32.totalorder %s4275_s30, %s3211_s21 }
 0x115   : > { %v1395_v18 = vsel %vm3920_vm11, %v1390_v6, %v1394_v44  ;;  %v802_v19 = vor.u32 %v801_v7, %v797_v3  ;;  %2758 = vmatprep.subr.bf16.mxu1 %v3065_v48  ;;  %v812_v21 = vrot.slane %v810_v9, 4  ;;  %v815_v24 = vrot.slane %v813_v10, 5  ;;  %v3066_v2 = vld [vmem:[#allocation9 + $0x60] sm:$0xff]   ;;  %p3209_p4 = pneg %p3208_p0  ;;  %p3214_p5 = scmp.lt.s32.totalorder %s3212_s3, %s3206_s11 }
 0x116   : > { %v2604_v27 = vcombine.low %v1385_v11, %v1395_v18  ;;  %v793_v29 = vrot.slane %v792_v12, 4  ;;  %v821_v32 = vrot.slane %v819_v15, 5  ;;  %v823_v33 = vshrl.u32 %v3973_v57, 16  ;;  %v1561_v12 = vld [vmem:[#allocation2 + $0x30] sm:$0xe] }
 0x117   : > { %v803_v35 = vrot.slane %v802_v19, 4  ;;  %v816_v36 = vor.u32 %v815_v24, %v812_v21  ;;  %v829_v39 = vshll.u32 %v3977_v5, 16  ;;  %v2613_v42 = vrot.slane %v1558_v17, 9  ;;  %p3215_p2 = por %p3214_p5, %p3213_p8 }
 0x118   : > { %2797 = vmatmul.mubr.msk.bf16.vlgmr.msra.gmra.mrb[0].mxu0 %vm862_vm12, %v2604_v27  ;;  %v798_v43 = vsel %vm3920_vm11, %v793_v29, %v797_v3  ;;  %v825_v44 = vrot.slane %v823_v33, 4  ;;  %2759 = vmatpush3.bf16.msra.mxu1 %v3065_v48  ;;  %v1578_v46 = vrot.slane %v1576_v53, 4  ;;  %v2614_v49 = vrot.slane %v1559_v25, 9  ;;  %v4011_v48 = vld [vmem:[#allocation2 + $0x28] sm:$0xf] }
 0x119   : > { %2805 = vmatpush3.bf16.msra.mxu0 %v3909_v31  ;;  %v808_v51 = vsel %vm3920_vm11, %v803_v35, %v807_v13  ;;  %v817_v52 = vrot.slane %v816_v36, 4  ;;  %v831_v58 = vrot.slane %v829_v39, 5  ;;  %v1577_v61 = vsel %vm3993_vm15, %v2613_v42, %v1576_v53  ;;  %2768 = vmatprep.subr.bf16.mxu1 %v3988_v26  ;;  %v4020_v53 = vld [vmem:[#allocation2 + $0x34] sm:$0xf]  ;;  %v1049_v27 = vld [vmem:[#allocation2] sm:$0xe]  ;;  %p3216_p7 = pnand %p3215_p2, %p3209_p4 }
 0x11a   : > { %2806 = vmatprep.subr.bf16.mxu0 %v3064_v30  ;;  %v2561_v63 = vcombine.low %v798_v43, %v808_v51  ;;  %v826_v0 = vor.u32 %v825_v44, %v821_v32  ;;  %v1580_v31 = vsel %vm3993_vm15, %v1578_v46, %v1579_v14  ;;  %v1583_v37 = vrot.slane %v3942_v8, 5  ;;  %v1050_v36 = vld [vmem:[#allocation2 + $0xc] sm:$0xe]  ;;  %v4052_v39 = vld [vmem:[#allocation2 + $0x18] sm:$0xe] }
 0x11b   : > { %v2617_v3 = vcombine.low %v1577_v61, %v1580_v31  ;;  %v2615_v4 = vrot.slane %v1560_v50, 9  ;;  %v822_v6 = vsel %vm3920_vm11, %v817_v52, %v821_v32  ;;  %v1590_v10 = vrot.slane %v4011_v48, 5  ;;  %v3070_v32 = vld [vmem:[#allocation9 + $0x68] sm:$0xff]   ;;  %v4064_v51 = vld [vmem:[#allocation9 + $0x70] sm:$0xff]   ;;  %v4069_v61 = vld [vmem:[#allocation2 + $0x24] sm:$0xe] }
 0x11c   : > { %2752 = vmatprep.mubr.msk.bf16.mxu1 %vm862_vm12, %v2561_v63  ;;  %v827_v7 = vrot.slane %v826_v0, 4  ;;  %v1585_v9 = vrot.slane %v1583_v37, 4  ;;  %v1584_v8 = vsel %vm3993_vm15, %v2614_v49, %v1583_v37  ;;  %v2569_v14 = vcombine.low %v3895_v1, %v3897_v54  ;;  %v3072_v50 = vld [vmem:[#allocation9 + $0x28] sm:$0xff]   ;;  %v1847_v63 = vld [vmem:[#allocation2 + $0x18] sm:$0xf] }
 0x11d   : > { %2807 = vmatpush3.bf16.msra.mxu0 %v3064_v30  ;;  %2808 = vmatprep.mubr.msk.bf16.mxu0 %vm862_vm12, %v2617_v3  ;;  %v1593_v11 = vrot.slane %v4013_v62, 5  ;;  %v1591_v17 = vsel %vm3993_vm15, %v2615_v4, %v1590_v10  ;;  %v1592_v18 = vrot.slane %v1590_v10, 4  ;;  %v1069_v21 = vrot.slane %v3899_v22, 5  ;;  %v4071_v0 = vld [vmem:[#allocation2 + $0x1c] sm:$0xf] }
 0x11e   : > { %v832_v13 = vsel %vm3920_vm11, %v827_v7, %v831_v58  ;;  %2816 = vmatprep.subr.bf16.mxu0 %v3066_v2  ;;  %v1587_v15 = vsel %vm3993_vm15, %v1585_v9, %v1586_v40  ;;  %v1597_v25 = vrot.slane %v4020_v53, 5  ;;  %v1073_v30 = vrot.slane %v3932_v59, 5  ;;  %v3074_v58 = vld [vmem:[#allocation2 + $0x18] sm:$0xff]   ;;  %v4076_v37 = vld [vmem:[#allocation2 + $0x20] sm:$0x1] }
 0x11f   : > { %v2562_v19 = vcombine.low %v822_v6, %v832_v13  ;;  %v2618_v1 = vcombine.low %v1584_v8, %v1587_v15  ;;  %v1594_v24 = vsel %vm3993_vm15, %v1592_v18, %v1593_v11  ;;  %v2616_v40 = vrot.slane %v1561_v12, 9  ;;  %v4081_v3 = vld [vmem:[#allocation9 + $0x30] sm:$0xff]   ;;  %v1850_v11 = vld [vmem:[#allocation2 + $0x24] sm:$0xf]  ;;  %v4094_v15 = vld [vmem:[#allocation2 + $0x28] sm:$0xf] }
 0x120   : > { %v2619_v16 = vcombine.low %v1591_v17, %v1594_v24  ;;  %v1600_v29 = vrot.slane %v4026_v38, 5  ;;  %v1599_v33 = vrot.slane %v1597_v25, 4  ;;  %v2579_v22 = vrot.slane %v1049_v27, 9 }
 0x121   : > { %2753 = vmatmul.mubr.msk.bf16.gmra.mrb[4].mxu1 %vm862_vm12, %v2562_v19  ;;  %v1066_v35 = vrot.slane %v3897_v54, 5  ;;  %v2570_v42 = vcombine.low %v3928_v55, %v3932_v59  ;;  %v1598_v43 = vsel %vm3993_vm15, %v2616_v40, %v1597_v25  ;;  %v1076_v54 = vrot.slane %v3934_v60, 5  ;;  %v3076_v40 = vld [vmem:[#allocation2 + $0x24] sm:$0xff]  }
 0x122   : > { %2760 = vmatprep.mubr.msk.bf16.mxu1 %vm862_vm12, %v2569_v14  ;;  %v1601_v44 = vsel %vm3993_vm15, %v1599_v33, %v1600_v29  ;;  %v2571_v49 = vcombine.low %v3953_v23, %v3956_v28  ;;  %v2580_v52 = vrot.slane %v1050_v36, 9  ;;  %v1080_v55 = vrot.slane %v3956_v28, 5 }
 0x123   : > { %v1068_v46 = vrot.slane %v1066_v35, 4  ;;  %v2572_v59 = vcombine.low %v3971_v56, %v3973_v57  ;;  %v2620_v60 = vcombine.low %v1598_v43, %v1601_v44  ;;  %v1067_v31 = vsel %vm3993_vm15, %v2579_v22, %v1066_v35  ;;  %v3078_v22 = vld [vmem:[#allocation2 + $0x30] sm:$0xff]   ;;  %v3079_v44 = vld [vmem:[#allocation9 + $0x78] sm:$0xff]  }
 0x124   : > { %2809 = vmatmul.mubr.msk.bf16.vlgmr.msra.gmra.mrb[0].mxu0 %vm862_vm12, %v2618_v1  ;;  %v1075_v23 = vrot.slane %v1073_v30, 4  ;;  %v1083_v4 = vrot.slane %v3964_v45, 5  ;;  %v1860_v6 = vshrl.u32 %v1847_v63, 16  ;;  %v1863_v7 = vshll.u32 %v1847_v63, 16  ;;  %v4107_v1 = vld [vmem:[#allocation2 + $0x2c] sm:$0x1] }
 0x125   : > { %2817 = vmatpush3.bf16.msra.mxu0 %v3066_v2  ;;  %2812 = vmatprep.mubr.msk.bf16.mxu0 %vm862_vm12, %v2619_v16  ;;  %v2581_v2 = vrot.slane %v4052_v39, 9  ;;  %v1070_v56 = vsel %vm3993_vm15, %v1068_v46, %v1069_v21  ;;  %v2582_v9 = vrot.slane %v4069_v61, 9  ;;  %v1087_v10 = vrot.slane %v3973_v57, 5  ;;  %v1853_v43 = vld [vmem:[#allocation2 + $0x30] sm:$0xf] }
 0x126   : > { %2818 = vmatprep.subr.bf16.mxu0 %v3070_v32  ;;  %v1869_v8 = vshll.u32 %v4071_v0, 16  ;;  %v1873_v14 = vshrl.u32 %v4071_v0, 16  ;;  %v1082_v45 = vrot.slane %v1080_v55, 4  ;;  %v1862_v12 = vrot.slane %v1860_v6, 4 }
 0x127   : > { %v1865_v13 = vrot.slane %v1863_v7, 5  ;;  %v4099_v17 = vsel %vm3993_vm15, %v2580_v52, %v1073_v30  ;;  %v4103_v18 = vsel %vm3993_vm15, %v1075_v23, %v1076_v54  ;;  %v1884_v25 = vshrl.u32 %v1850_v11, 16  ;;  %v1856_v7 = vld [vmem:[#allocation2 + $0x3c] sm:$0xf] }
 0x128   : > { %v4105_v19 = vrot.slane %v1869_v8, 5  ;;  %v1875_v21 = vrot.slane %v1873_v14, 4  ;;  %v1887_v27 = vshll.u32 %v1850_v11, 16  ;;  %v1893_v16 = vshll.u32 %v4094_v15, 16  ;;  %v4134_v8 = vld [vmem:[#allocation2 + $0x38] sm:$0x1] }
 0x129   : > { %2761 = vmatmul.mubr.msk.bf16.vlgmr.msra.gmra.mrb[0].mxu1 %vm862_vm12, %v2570_v42  ;;  %2819 = vmatpush3.bf16.msra.mxu0 %v3070_v32  ;;  %v1866_v24 = vor.u32 %v1865_v13, %v1862_v12  ;;  %v2583_v30 = vcombine.low %v1067_v31, %v1070_v56  ;;  %v1090_v29 = vrot.slane %v3977_v5, 5  ;;  %v1897_v33 = vshrl.u32 %v4094_v15, 16  ;;  %v4138_v12 = vld [vmem:[#allocation2 + $0x40] sm:$0xf] }
 0x12a   : > { %2769 = vmatpush3.bf16.msra.mxu1 %v3988_v26  ;;  %2764 = vmatprep.mubr.msk.bf16.mxu1 %vm862_vm12, %v2571_v49  ;;  %v1879_v26 = vshll.u32 %v4076_v37, 16  ;;  %v1876_v32 = vor.u32 %v1875_v21, %v4105_v19  ;;  %v1089_v35 = vrot.slane %v1087_v10, 4  ;;  %v1886_v39 = vrot.slane %v1884_v25, 4  ;;  %v4120_v49 = vld [vmem:[#allocation2 + $0x34] sm:$0xf] }
 0x12b   : > { %2770 = vmatprep.subr.bf16.mxu1 %v3072_v50  ;;  %2828 = vmatprep.subr.bf16.mxu0 %v4064_v51  ;;  %v1903_v42 = vshll.u32 %v4107_v1, 16  ;;  %v1889_v46 = vrot.slane %v1887_v27, 5  ;;  %v4118_v54 = vrot.slane %v1893_v16, 5  ;;  %v1899_v5 = vrot.slane %v1897_v33, 4  ;;  %v3081_v27 = vld [vmem:[#allocation9 + $0x38] sm:$0xff]  }
 0x12c   : > { %2813 = vmatmul.mubr.msk.bf16.gmra.mrb[4].mxu0 %vm862_vm12, %v2620_v60  ;;  %v1881_v36 = vrot.slane %v1879_v26, 5  ;;  %v1867_v52 = vrot.slane %v1866_v24, 4  ;;  %v1911_v63 = vshll.u32 %v1853_v43, 16  ;;  %v1917_v60 = vshll.u32 %v4120_v49, 16 }
 0x12d   : > { %2820 = vmatprep.mubr.msk.bf16.mxu0 %vm862_vm12, %v3074_v58  ;;  %v1877_v58 = vrot.slane %v1876_v32, 4  ;;  %v1081_v31 = vsel %vm3993_vm15, %v2581_v2, %v1080_v55  ;;  %v1084_v23 = vsel %vm3993_vm15, %v1082_v45, %v1083_v4  ;;  %v1921_v6 = vshrl.u32 %v4120_v49, 16 }
 0x12e   : > { %2771 = vmatpush3.bf16.msra.mxu1 %v3072_v50  ;;  %v1908_v50 = vshrl.u32 %v1853_v43, 16  ;;  %v1913_v14 = vrot.slane %v1911_v63, 5  ;;  %v4136_v11 = vrot.slane %v1917_v60, 5  ;;  %v1890_v28 = vor.u32 %v1889_v46, %v1886_v39  ;;  %v2069_v63 = vld [vmem:[#allocation2 + $0x18] sm:$0xe] }
 0x12f   : > { %2780 = vmatprep.subr.bf16.mxu1 %v4081_v3  ;;  %v1900_v55 = vor.u32 %v1899_v5, %v4118_v54  ;;  %v1923_v2 = vrot.slane %v1921_v6, 4  ;;  %v1932_v4 = vshrl.u32 %v1856_v7, 16  ;;  %v2585_v45 = vcombine.low %v1081_v31, %v1084_v23  ;;  %v3083_v23 = vld [vmem:[#allocation2 + $0xc] sm:$0xff]  }
 0x130   : > { %v1910_v56 = vrot.slane %v1908_v50, 4  ;;  %v1872_v13 = vsel %vm3920_vm11, %v1867_v52, %v4105_v19  ;;  %v1935_v26 = vshll.u32 %v1856_v7, 16  ;;  %v1927_v25 = vshll.u32 %v4134_v8, 16 }
 0x131   : > { %2765 = vmatmul.mubr.msk.bf16.gmra.mrb[4].mxu1 %vm862_vm12, %v2572_v59  ;;  %v2584_v59 = vcombine.low %v4099_v17, %v4103_v18  ;;  %v1941_v17 = vshll.u32 %v4138_v12, 16  ;;  %v1882_v18 = vsel %vm3920_vm11, %v1877_v58, %v1881_v36  ;;  %v1924_v24 = vor.u32 %v1923_v2, %v4136_v11 }
 0x132   : > { %2772 = vmatprep.mubr.msk.bf16.mxu1 %vm862_vm12, %v2583_v30  ;;  %v1914_v21 = vor.u32 %v1913_v14, %v1910_v56  ;;  %v1088_v19 = vsel %vm3993_vm15, %v2582_v9, %v1087_v10  ;;  %v1091_v16 = vsel %vm3993_vm15, %v1089_v35, %v1090_v29  ;;  %v1891_v30 = vrot.slane %v1890_v28, 4  ;;  %v1342_v9 = vld [vmem:[#allocation2 + $0x24] sm:$0xf] }
 0x133   : > { %v1901_v32 = vrot.slane %v1900_v55, 4  ;;  %v1905_v33 = vrot.slane %v1903_v42, 5  ;;  %v1945_v36 = vshrl.u32 %v4138_v12, 16  ;;  %v2637_v57 = vcombine.low %v1872_v13, %v1882_v18 }
 0x134   : > { %2821 = vmatmul.mubr.msk.bf16.vlgmr.msra.gmra.mrb[0].mxu0 %vm862_vm12, %v3076_v40  ;;  %v3082_v40 = vld [vmem:[#allocation9 + $0x80] sm:$0xff]   ;;  %v1934_v39 = vrot.slane %v1932_v4, 4  ;;  %v1937_v61 = vrot.slane %v1935_v26, 5  ;;  %v4164_v43 = vrot.slane %v1941_v17, 5  ;;  %v1915_v10 = vrot.slane %v1914_v21, 4 }
 0x135   : > { %2829 = vmatpush3.bf16.msra.mxu0 %v4064_v51  ;;  %2824 = vmatprep.mubr.msk.bf16.mxu0 %vm862_vm12, %v3078_v22  ;;  %v3080_v51 = vld [vmem:[#allocation2 + $0x3c] sm:$0xff]   ;;  %v4160_v22 = vld [vmem:[#allocation2 + $0x44] sm:$0x1]  ;;  %v1925_v29 = vrot.slane %v1924_v24, 4  ;;  %v1929_v35 = vrot.slane %v1927_v25, 5  ;;  %v1947_v42 = vrot.slane %v1945_v36, 4  ;;  %v2586_v46 = vcombine.low %v1088_v19, %v1091_v16 }
 0x136   : > { %2830 = vmatprep.subr.bf16.mxu0 %v3079_v44  ;;  %v1906_v5 = vsel %vm3920_vm11, %v1901_v32, %v1905_v33  ;;  %v1397_v50 = vshrl.u32 %v1342_v9, 16  ;;  %v1938_v52 = vor.u32 %v1937_v61, %v1934_v39  ;;  %v1400_v60 = vshll.u32 %v1342_v9, 16  ;;  %v1345_v25 = vld [vmem:[#allocation2 + $0x30] sm:$0xf]  ;;  %v3084_v19 = vld [vmem:[#allocation2 + $0x18] sm:$0xff]  }
 0x137   : > { %v1948_v58 = vor.u32 %v1947_v42, %v4164_v43  ;;  %v1406_v31 = vshll.u32 %v4011_v48, 16  ;;  %v1930_v56 = vsel %vm3920_vm11, %v1925_v29, %v1929_v35  ;;  %v2087_v6 = vrot.slane %v4071_v0, 5  ;;  %v3085_v0 = vld [vmem:[#allocation9 + $0x88] sm:$0xff]  }
 0x138   : > { %v1399_v7 = vrot.slane %v1397_v50, 4  ;;  %v1410_v28 = vshrl.u32 %v4011_v48, 16  ;;  %v2647_v4 = vrot.slane %v2069_v63, 9  ;;  %v2090_v18 = vrot.slane %v4076_v37, 5  ;;  %v2071_v33 = vld [vmem:[#allocation2 + $0x30] sm:$0xe] }
 0x139   : > { %2773 = vmatmul.mubr.msk.bf16.vlgmr.msra.gmra.mrb[0].mxu1 %vm862_vm12, %v2584_v59  ;;  %2831 = vmatpush3.bf16.msra.mxu0 %v3079_v44  ;;  %v1896_v44 = vsel %vm3920_vm11, %v1891_v30, %v4118_v54  ;;  %v1920_v54 = vsel %vm3920_vm11, %v1915_v10, %v4136_v11  ;;  %v1402_v59 = vrot.slane %v1400_v60, 5  ;;  %v4185_v14 = vrot.slane %v1406_v31, 5  ;;  %v2070_v30 = vld [vmem:[#allocation2 + $0x24] sm:$0xe]  ;;  %v3087_v60 = vld [vmem:[#allocation2 + $0x30] sm:$0xff]  }
 0x13a   : > { %2781 = vmatpush3.bf16.msra.mxu1 %v4081_v3  ;;  %2776 = vmatprep.mubr.msk.bf16.mxu1 %vm862_vm12, %v2585_v45  ;;  %v1951_v3 = vshll.u32 %v4160_v22, 16  ;;  %v2638_v55 = vcombine.low %v1896_v44, %v1906_v5  ;;  %v2639_v45 = vcombine.low %v1920_v54, %v1930_v56  ;;  %v1939_v11 = vrot.slane %v1938_v52, 4 }
 0x13b   : > { %2782 = vmatprep.subr.bf16.mxu1 %v3081_v27  ;;  %2840 = vmatprep.subr.bf16.mxu0 %v3082_v40  ;;  %v1949_v13 = vrot.slane %v1948_v58, 4  ;;  %v1412_v26 = vrot.slane %v1410_v28, 4  ;;  %v2089_v17 = vrot.slane %v2087_v6, 4  ;;  %v1403_v21 = vor.u32 %v1402_v59, %v1399_v7  ;;  %v2072_v7 = vld [vmem:[#allocation2 + $0x3c] sm:$0xe] }
 0x13c   : > { %2825 = vmatmul.mubr.msk.bf16.gmra.mrb[4].mxu0 %vm862_vm12, %v3080_v51  ;;  %v1953_v2 = vrot.slane %v1951_v3, 5  ;;  %v1416_v48 = vshll.u32 %v4013_v62, 16  ;;  %v1430_v51 = vshll.u32 %v4020_v53, 16  ;;  %v1944_v37 = vsel %vm3920_vm11, %v1939_v11, %v4164_v43 }
 0x13d   : > { %2832 = vmatprep.mubr.msk.bf16.mxu0 %vm862_vm12, %v2637_v57  ;;  %v1413_v24 = vor.u32 %v1412_v26, %v4185_v14  ;;  %v2088_v62 = vsel %vm3993_vm15, %v2647_v4, %v2087_v6  ;;  %v2094_v32 = vrot.slane %v4094_v15, 5  ;;  %v2101_v36 = vrot.slane %v4120_v49, 5 }
 0x13e   : > { %2783 = vmatpush3.bf16.msra.mxu1 %v3081_v27  ;;  %v1434_v27 = vshrl.u32 %v4020_v53, 16  ;;  %v1954_v16 = vsel %vm3920_vm11, %v1949_v13, %v1953_v2  ;;  %v3086_v53 = vld [vmem:[#allocation2 + $0x24] sm:$0xff]   ;;  %v1421_v57 = vshrl.u32 %v1345_v25, 16  ;;  %v1424_v39 = vshll.u32 %v1345_v25, 16 }
 0x13f   : > { %2852 = vmatprep.subr.bf16.mxu1 %v3889_v20  ;;  %v1404_v61 = vrot.slane %v1403_v21, 4  ;;  %v1414_v43 = vrot.slane %v1413_v24, 4  ;;  %v1418_v9 = vrot.slane %v1416_v48, 5  ;;  %v1432_v10 = vrot.slane %v1430_v51, 5  ;;  %v2661_v48 = vld [vmem:[%s4441_s5] ss:$0 sm:$0xff] }
 0x140   : > { %v1436_v29 = vrot.slane %v1434_v27, 4  ;;  %v2640_v35 = vcombine.low %v1944_v37, %v1954_v16  ;;  %v2648_v42 = vrot.slane %v2070_v30, 9  ;;  %v2097_v44 = vrot.slane %v4107_v1, 5 }
 0x141   : > { %2777 = vmatmul.mubr.msk.bf16.gmra.mrb[4].mxu1 %vm862_vm12, %v2586_v46  ;;  %v2096_v46 = vrot.slane %v2094_v32, 4  ;;  %v2649_v5 = vrot.slane %v2071_v33, 9  ;;  %v2103_v49 = vrot.slane %v2101_v36, 4  ;;  %v2104_v3 = vrot.slane %v4134_v8, 5 }
 0x142   : > { %2784 = vmatprep.mubr.msk.bf16.mxu1 %vm862_vm12, %v3083_v23  ;;  %v1423_v50 = vrot.slane %v1421_v57, 4  ;;  %v1426_v52 = vrot.slane %v1424_v39, 5  ;;  %v1409_v58 = vsel %vm3920_vm11, %v1404_v61, %v4185_v14  ;;  %v1419_v63 = vsel %vm3920_vm11, %v1414_v43, %v1418_v9 }
 0x143   : > { %v1440_v1 = vshll.u32 %v4026_v38, 16  ;;  %v2095_v8 = vsel %vm3993_vm15, %v2648_v42, %v2094_v32  ;;  %v2098_v31 = vsel %vm3993_vm15, %v2096_v46, %v2097_v44  ;;  %v2108_v23 = vrot.slane %v4138_v12, 5 }
 0x144   : > { %2833 = vmatmul.mubr.msk.bf16.vlgmr.msra.gmra.mrb[0].mxu0 %vm862_vm12, %v2638_v55  ;;  %v2605_v54 = vcombine.low %v1409_v58, %v1419_v63  ;;  %v2102_v38 = vsel %vm3993_vm15, %v2649_v5, %v2101_v36  ;;  %v2105_v56 = vsel %vm3993_vm15, %v2103_v49, %v2104_v3  ;;  %v1427_v6 = vor.u32 %v1426_v52, %v1423_v50 }
 0x145   : > { %2841 = vmatpush3.bf16.msra.mxu0 %v3082_v40  ;;  %2836 = vmatprep.mubr.msk.bf16.mxu0 %vm862_vm12, %v2639_v45  ;;  %v2091_v40 = vsel %vm3993_vm15, %v2089_v17, %v2090_v18  ;;  %v2652_v59 = vcombine.low %v2095_v8, %v2098_v31  ;;  %v2653_v14 = vcombine.low %v2102_v38, %v2105_v56  ;;  %v2650_v28 = vrot.slane %v2072_v7, 9 }
 0x146   : > { %2842 = vmatprep.subr.bf16.mxu0 %v3085_v0  ;;  %v2651_v15 = vcombine.low %v2088_v62, %v2091_v40  ;;  %v2110_v55 = vrot.slane %v2108_v23, 4  ;;  %v2111_v2 = vrot.slane %v4160_v22, 5  ;;  %v1442_v4 = vrot.slane %v1440_v1, 5 }
 0x147   : > { %v2109_v45 = vsel %vm3993_vm15, %v2650_v28, %v2108_v23  ;;  %vm2242_vm0 = vcmask 523264  }
 0x148   : > { %v2112_v11 = vsel %vm3993_vm15, %v2110_v55, %v2111_v2 }
 0x149   : > { %2785 = vmatmul.mubr.msk.bf16.vlgmr.msra.gmra.mrb[0].mxu1 %vm862_vm12, %v3084_v19  ;;  %2843 = vmatpush3.bf16.msra.mxu0 %v3085_v0  ;;  %v2654_v26 = vcombine.low %v2109_v45, %v2112_v11 }
 0x14a   : > { %2854 = vmatpush3.bf16.msra.mxu1 %v3889_v20  ;;  %2788 = vmatprep.mubr.msk.bf16.mxu1 %vm862_vm12, %v3086_v53  ;;  %v1437_v20 = vor.u32 %v1436_v29, %v1432_v10 }
 0x14b   : > { %2853 = vmatprep.subr.bf16.mxu1 %v3892_v47 }
 0x14c   : > { %2837 = vmatmul.mubr.msk.bf16.gmra.mrb[4].mxu0 %vm862_vm12, %v2640_v35  ;;  %v1438_v12 = vrot.slane %v1437_v20, 4 }
 0x14d   : > { %2844 = vmatprep.mubr.msk.bf16.mxu0 %vm862_vm12, %v2651_v15 }
 0x14e   : > { %2855 = vmatpush3.bf16.msra.mxu1 %v3892_v47  ;;  %v1428_v47 = vrot.slane %v1427_v6, 4  ;;  %v1443_v22 = vsel %vm3920_vm11, %v1438_v12, %v1442_v4 }
 0x150   : > { %v1433_v13 = vsel %vm3920_vm11, %v1428_v47, %v1432_v10 }
 0x151   : > { %2789 = vmatmul.mubr.msk.bf16.gmra.mrb[4].mxu1 %vm862_vm12, %v3087_v60  ;;  %v2606_v0 = vcombine.low %v1433_v13, %v1443_v22 }
 0x152   : > { %2800 = vmatprep.mubr.msk.bf16.mxu1 %vm862_vm12, %v2605_v54 }
 0x154   : > { %2845 = vmatmul.mubr.msk.bf16.vlgmr.msra.gmra.mrb[0].mxu0 %vm862_vm12, %v2652_v59 }
 0x155   : > { %2848 = vmatprep.mubr.msk.bf16.mxu0 %vm862_vm12, %v2653_v14 }
 0x15c   : > { %2849 = vmatmul.mubr.msk.bf16.gmra.mrb[4].mxu0 %vm862_vm12, %v2654_v26 }
 0x15d   : > { %2801 = vmatmul.mubr.msk.bf16.vlgmr.msra.gmra.mrb[4].mxu1 %vm862_vm12, %v2606_v0 }
 0x21c   : > { %v2786_v17 = vpop.f32.mrb[0].mxu1 }
 0x21d   : > { %v1297_v18 = vpop.f32.mrb[1].mxu1 }
 0x21e   : > { %v2787_v21 = vpop.f32.mrb[2].mxu1 }
 0x21f   : > { %v1300_v24 = vpop.f32.mrb[3].mxu1 }
 0x227   : > { %v2846_v34 = vpop.f32.mrb[0].mxu0 }
 0x228   : > { %v2856_v41 = vadd.f32 %v2846_v34, %v2786_v17  ;;  %v2188_v25 = vpop.f32.mrb[1].mxu0 }
 0x229   : > { %v2857_v51 = vadd.f32 %v2188_v25, %v1297_v18  ;;  %v2847_v27 = vpop.f32.mrb[2].mxu0 }
 0x22a   : > { %v2236_v19 = vadd.f32 %v2856_v41, %v2661_v48  ;;  %v2858_v37 = vadd.f32 %v2847_v27, %v2787_v21  ;;  %v2191_v16 = vpop.f32.mrb[3].mxu0 }
 0x22b   : > { %v2234_v62 = vadd.f32 %v2857_v51, %v2661_v48  ;;  %v2859_v30 = vadd.f32 %v2191_v16, %v1300_v24 }
 0x22c   : > { %2245 = vst.msk [vmem:[%s3863_s9 + $0x10] sm:$0xff] %vm2242_vm0, %v2236_v19  ;;  %v2237_v32 = vadd.f32 %v2858_v37, %v2661_v48  ;;  %v2274_v33 = vmul.f32 %v2236_v19, %v2236_v19  ;;  %v2254_v43 = vsel %vm2242_vm0, %v2236_v19, 0.0 }
 0x22d   : > { %2243 = vst.msk [vmem:[%s3863_s9] sm:$0xff] %vm2242_vm0, %v2234_v62  ;;  %v2272_v53 = vmul.f32 %v2234_v62, %v2234_v62  ;;  %v2235_v40 = vadd.f32 %v2859_v30, %v2661_v48  ;;  %v2251_v36 = vsel %vm2242_vm0, %v2234_v62, 0.0 }
 0x22e   : > { %2246 = vst.msk [vmem:[%s3863_s9 + $0x18] sm:$0xff] %vm2242_vm0, %v2237_v32  ;;  %v2275_v42 = vmul.f32 %v2237_v32, %v2237_v32  ;;  %v2283_v63 = vsel %vm2242_vm0, %v2274_v33, 0.0  ;;  %v2256_v1 = vsel %vm2242_vm0, %v2237_v32, 0.0 }
 0x22f   : > { %2244 = vst.msk [vmem:[%s3863_s9 + $0x8] sm:$0xff] %vm2242_vm0, %v2235_v40  ;;  %v2252_v57 = vsel %vm2242_vm0, %v2235_v40, 0.0  ;;  %v2273_v39 = vmul.f32 %v2235_v40, %v2235_v40  ;;  %v2850_v61 = vpop.f32.mrb[4].mxu0  ;;  %v2280_v35 = vsel %vm2242_vm0, %v2272_v53, 0.0 }
 0x230   : > { %v2253_v9 = vadd.f32 %v2252_v57, %v2251_v36  ;;  %v2802_v10 = vpop.f32.mrb[4].mxu1  ;;  %v2204_v29 = vpop.f32.mrb[5].mxu0  ;;  %v2285_v56 = vsel %vm2242_vm0, %v2275_v42, 0.0 }
 0x231   : > { %v2281_v15 = vsel %vm2242_vm0, %v2273_v39, 0.0  ;;  %v2860_v46 = vadd.f32 %v2850_v61, %v2802_v10  ;;  %v1535_v44 = vpop.f32.mrb[5].mxu1  ;;  %v2851_v5 = vpop.f32.mrb[6].mxu0 }
 0x232   : > { %v2255_v49 = vadd.f32 %v2254_v43, %v2253_v9  ;;  %v2282_v3 = vadd.f32 %v2281_v15, %v2280_v35  ;;  %v2861_v50 = vadd.f32 %v2204_v29, %v1535_v44  ;;  %v2803_v52 = vpop.f32.mrb[6].mxu1  ;;  %v2207_v58 = vpop.f32.mrb[7].mxu0 }
 0x233   : > { %v2240_v20 = vadd.f32 %v2860_v46, %v2661_v48  ;;  %v2862_v60 = vadd.f32 %v2851_v5, %v2803_v52  ;;  %v1538_v8 = vpop.f32.mrb[7].mxu1 }
 0x234   : > { %v2284_v31 = vadd.f32 %v2283_v63, %v2282_v3  ;;  %v2238_v23 = vadd.f32 %v2861_v50, %v2661_v48  ;;  %v2257_v54 = vadd.f32 %v2256_v1, %v2255_v49  ;;  %v2863_v38 = vadd.f32 %v2207_v58, %v1538_v8 }
 0x235   : > { %2249 = vst.msk [vmem:[%s3863_s9 + $0x30] sm:$0xff] %vm2242_vm0, %v2240_v20  ;;  %v2241_v6 = vadd.f32 %v2862_v60, %v2661_v48  ;;  %v2278_v2 = vmul.f32 %v2240_v20, %v2240_v20 }
 0x236   : > { %2247 = vst.msk [vmem:[%s3863_s9 + $0x20] sm:$0xff] %vm2242_vm0, %v2238_v23  ;;  %v2258_v7 = vsel %vm2242_vm0, %v2238_v23, 0.0  ;;  %v2276_v59 = vmul.f32 %v2238_v23, %v2238_v23  ;;  %v2286_v14 = vadd.f32 %v2285_v56, %v2284_v31  ;;  %v2239_v28 = vadd.f32 %v2863_v38, %v2661_v48 }
 0x237   : > { %v2259_v55 = vadd.f32 %v2258_v7, %v2257_v54  ;;  %2250 = vst.msk [vmem:[%s3863_s9 + $0x38] sm:$0xff] %vm2242_vm0, %v2241_v6 }
 0x238   : > { %v2287_v12 = vsel %vm2242_vm0, %v2276_v59, 0.0  ;;  %2248 = vst.msk [vmem:[%s3863_s9 + $0x28] sm:$0xff] %vm2242_vm0, %v2239_v28  ;;  %v2260_v4 = vsel %vm2242_vm0, %v2239_v28, 0.0  ;;  %v2277_v47 = vmul.f32 %v2239_v28, %v2239_v28 }
 0x239   : > { %v2288_v45 = vadd.f32 %v2287_v12, %v2286_v14  ;;  %v2261_v11 = vadd.f32 %v2260_v4, %v2259_v55 }
 0x23a   : > { %3219 = shalt.err (!%p3216_p7)
}
 0x23b   : > { %s3220_s9 = scalar_lea.hbm %s4273_s17, 1024  ;;  %s3224_s29 = scalar_lea.hbm %s4443_s14, 4096 }
 0x23c   : > { %p3221_p6 = scmp.ne.s32.totalorder %s4273_s17, %s3220_s9  ;;  %p3225_p9 = scmp.lt.u32.totalorder %s4273_s17, %s4443_s14 }
 0x23d   : > { %p3226_p11 = scmp.lt.u32.totalorder %s3224_s29, %s3220_s9  ;;  %p3228_p1 = scmp.lt.u32.totalorder %s3220_s9, %s4273_s17 }
 0x23e   : > { %p3222_p3 = pnand %p3221_p6, %p4444_p10 }
 0x23f   : > { %p3227_p12 = por %p3226_p11, %p3225_p9 }
 0x240   : > { %p3223_p13 = pneg %p3222_p3 }
 0x241   : > { %p3229_p0 = por %p3228_p1, %p3227_p12 }
 0x243   : > { %p3230_p4 = pnand %p3229_p0, %p3223_p13 }
 0x245   : > { %3233 = shalt.err (!%p3230_p4)
}
 0x246   : > { %s3360_s6 = smov 128   ;;  %s3361_s19 = smov 8   ;;  %v2262_v13 = vsel %vm2242_vm0, %v2240_v20, 0.0  ;;  %v2279_v22 = vmul.f32 %v2241_v6, %v2241_v6  ;;  %v2289_v26 = vsel %vm2242_vm0, %v2277_v47, 0.0  ;;  %v2291_v18 = vsel %vm2242_vm0, %v2278_v2, 0.0 }
 0x247   : > { %2930 = dma.vmem_to_hbm [thread:$0]  (%p4444_p10), %s4275_s30, 1024, %s4273_s17, %s2306_s20, %s3360_s6, %s3360_s6, %s3361_s19   ;;  %v2263_v0 = vadd.f32 %v2262_v13, %v2261_v11  ;;  %v2290_v17 = vadd.f32 %v2289_v26, %v2288_v45  ;;  %v2264_v21 = vsel %vm2242_vm0, %v2241_v6, 0.0  ;;  %vm2301_vm1 = vcmask 1040384  }
 0x248   : > { %v2293_v48 = vsel %vm2242_vm0, %v2279_v22, 0.0  ;;  %vm2303_vm2 = vcmask 517120  }
 0x249   : > { %v2265_v24 = vadd.f32 %v2264_v21, %v2263_v0  ;;  %v2292_v34 = vadd.f32 %v2291_v18, %v2290_v17 }
 0x24b   : > { %v2266_v41 = vrot.slane %v2265_v24, 4  ;;  %v2294_v25 = vadd.f32 %v2293_v48, %v2292_v34 }
 0x24d   : > { %v2267_v51 = vadd.f32 %v2266_v41, %v2265_v24  ;;  %v2295_v27 = vrot.slane %v2294_v25, 4 }
 0x24f   : > { %v2268_v19 = vrot.slane %v2267_v51, 2  ;;  %v2296_v37 = vadd.f32 %v2295_v27, %v2294_v25 }
 0x251   : > { %v2269_v16 = vadd.f32 %v2268_v19, %v2267_v51  ;;  %v2297_v62 = vrot.slane %v2296_v37, 2 }
 0x253   : > { %v2270_v30 = vrot.slane %v2269_v16, 1  ;;  %v2298_v32 = vadd.f32 %v2297_v62, %v2296_v37 }
 0x255   : > { %v2299_v53 = vrot.slane %v2298_v32, 1  ;;  %v2271_v40 = vadd.f32 %v2270_v30, %v2269_v16 }
 0x257   : > { %v2300_v33 = vadd.f32 %v2299_v53, %v2298_v32 }
 0x259   : > { %v2302_v36 = vsel %vm2301_vm1, %v2271_v40, %v2300_v33 }
 0x25a   : > { %2304 = vst.msk [vmem:[%s3779_s2] sm:$0x3] %vm2303_vm2, %v2302_v36 }
 0x25b PF: > { %p2953_p10 = scmp.ge.s32.totalorder %s3348_s8, 2  ;;  %s2347_s16 = sand.u32 1, %s3328_s27  }
 0x25c   : > { %p4445_p8 = scmp.ne.s32.totalorder %s4407_s15, 0  ;;  %s2348_s18 = scalar_lea.sflag [#allocation5], %s2347_s16 }
 0x25e   : > { %p2947_p5 = pnand %p2953_p10, %p4445_p8 }
 0x260   : > { %3299 = dma.done.wait (!%p2947_p5), %s2348_s18, 1024  }
 0x261   : > { %3301 = vsyncadd (!%p2947_p5), %s2348_s18, 4294966272  ;;  %s27_s8 = sadd.s32 1, %s3348_s8   ;;  %s4446_s2 = sld [smem:[#allocation17_spill]] }
 0x262   : > { %p24_p2 = scmp.ge.s32.totalorder %s27_s8, 6   ;;  %s4447_s29 = sld [smem:[#allocation21_spill]] }
 0x263   : > { %s4448_s30 = sld [smem:[#allocation19_spill]]  ;;  %s4449_s1 = sld [smem:[#allocation20_spill]] }
 0x264   : > { %s4450_s21 = smov %s3308_s22  ;;  %s4451_s22 = smov %s3312_s23 }
 0x265   : > { %s4452_s23 = smov %s3678_s7  ;;  %s4453_s24 = smov %s3320_s25 }
 0x266   : > { %s4454_s25 = smov %s3324_s26  ;;  %s4455_s26 = smov %s3488_s13 }
 0x267   : > { %s4456_s27 = smov %s3332_s28  ;;  %s4457_s28 = smov %s4446_s2 }
 0x268   :  { %26 = sbr.rel (!%p24_p2) target bundleno = 20 (0x14), region = 144 }
 0x269   : > { %s4458_s7 = smov %s4449_s1 }
 0x26f   :  { %2364 = vsyncpa [#allocation4], 1 }
 0x270   :  { %2366 = vsyncpa [#allocation4 + $0x1], 1 }
 0x271   :  { %2367 = vsyncpa [#allocation7], 1 }
 0x272   :  { %2369 = vsyncpa [#allocation7 + $0x1], 1 }
 0x273   :  { %2370 = vsyncpa [#allocation10], 1 }
 0x274   :  { %2371 = vsyncpa [#allocation5], 1 }
 0x275   :  { %2373 = vsyncpa [#allocation5 + $0x1], 1 }

</bundles_post_ra>
